<compile_context>
chip_gen: v7x
topology: tpu7x:2x2x1
jax: 0.10.0
libtpu: 0.0.40
codegen_flags: <defaults>
</compile_context>

<pallas_src>
import functools

import jax
import jax.numpy as jnp
from jax.experimental import pallas as pl
from jax.experimental.pallas import tpu as pltpu


def lstm_fc_kernel(seq_len, hidden, fc_hidden, out_size,
                   x_ref,                        # (T*B, D) bf16, row = t*B + b
                   w_ih0_ref,                    # (D, 4H)  bf16, gate-permuted
                   w_big_ref,                    # (2H, 8H) bf16, fused block weight
                   misc_ref,                     # (R, 4H)  f32, packed small params
                   out_ref,                      # (B, O)   f32
                   hcat_ref):                    # (B, 2H)  f32 scratch: [h1 | h2]
    T, H, Hh, O = seq_len, hidden, fc_hidden, out_size
    TB = x_ref.shape[0]
    B = TB // T
    H3, H4 = 3 * H, 4 * H

    # ---- unpack packed f32 parameter slab (static slices, read once) ----
    b0 = misc_ref[0:1, :]                                   # (1, 4H)
    b1 = jnp.broadcast_to(misc_ref[1:2, :], (B, H4))        # hoisted broadcast
    fc1_b = misc_ref[2:3, :Hh]
    fc2_b = misc_ref[3:4, :O]
    fc1_w = misc_ref[8:8 + H, :Hh]
    fc2_w = misc_ref[8 + H:8 + H + Hh, :O]

    # ---- hoisted layer-0 input projection + bias: one bf16 matmul ----
    xw0 = (jnp.dot(x_ref[...], w_ih0_ref[...],
                   preferred_element_type=jnp.float32) + b0)   # (T*B, 4H) f32

    w_big = w_big_ref[...]                                     # (2H, 8H) bf16

    def activate(gates, c):
        # Gate order (i, f, o | g): one sigmoid over a (B, 3H) slab, one tanh
        # over the trailing (B, H) slab (2 EUP pushes per cell).
        sig = jax.nn.sigmoid(gates[:, :H3])
        g = jnp.tanh(gates[:, H3:])
        i, f, o = sig[:, :H], sig[:, H:2 * H], sig[:, 2 * H:H3]
        c_new = f * c + i * g
        return o * jnp.tanh(c_new), c_new

    # Persistent [h1 | h2] matmul operand; zero initial state.
    hcat_ref[...] = jnp.zeros_like(hcat_ref)
    c1 = jnp.zeros((B, H), jnp.float32)
    c2 = jnp.zeros((B, H), jnp.float32)
    recur0 = jnp.zeros((B, H4), jnp.float32)    # h1(t-1) @ w_hh0; zero at t=0
    h2 = jnp.zeros((B, H), jnp.float32)

    # T is small & static -> full unroll so the scheduler sees the recurrence.
    for t in range(T):
        # Layer 0: precomputed input projection + previous fused-matmul half.
        h1, c1 = activate(xw0[t * B:(t + 1) * B, :] + recur0, c1)
        hcat_ref[:, :H] = h1
        # Fused step matmul: [h1(t) | h2(t-1)] @ [[w_hh0, w_ih1],[0, w_hh1]].
        big = jnp.dot(hcat_ref[...].astype(jnp.bfloat16), w_big,
                      preferred_element_type=jnp.float32)      # (B, 8H) f32
        recur0 = big[:, :H4]                     # layer-0 recurrence for t+1
        h2, c2 = activate(big[:, H4:] + b1, c2)  # layer-1 gates for step t
        hcat_ref[:, H:] = h2

    # out[:, -1, :] == h2 after the last step; fc head (dropouts are identity).
    z = jnp.dot(h2, fc1_w, preferred_element_type=jnp.float32) + fc1_b
    z = jnp.maximum(z, 0.0)                      # ReLU
    out_ref[...] = jnp.dot(z, fc2_w, preferred_element_type=jnp.float32) + fc2_b


def _perm_gates(w):
    """Permute gate columns from PyTorch order (i,f,g,o) to kernel order (i,f,o,g)."""
    H = w.shape[-1] // 4
    return jnp.concatenate([w[..., :2 * H], w[..., 3 * H:], w[..., 2 * H:3 * H]],
                           axis=-1)


def prepare_params(params):
    """One-time parameter preparation (hoisted out of the forward path).

    Returns bf16 matmul weights (layer-0 input weight, fused recurrent block
    weight) plus a single packed f32 slab holding all small parameters.
    """
    H = params["w_hh0"].shape[0]
    Hh = params["fc1_w"].shape[1]
    O = params["fc2_w"].shape[1]
    H4 = 4 * H
    assert Hh <= H4 and O <= H4

    w_ih0 = _perm_gates(params["w_ih0"]).astype(jnp.bfloat16)       # (D, 4H)
    w_hh0 = _perm_gates(params["w_hh0"])
    w_ih1 = _perm_gates(params["w_ih1"])
    w_hh1 = _perm_gates(params["w_hh1"])
    # Fused per-step weight:  [h1 | h2_prev] @ W_big gives
    #   cols [:4H] = h1 @ w_hh0                      (layer-0 recurrence, next step)
    #   cols [4H:] = h1 @ w_ih1 + h2_prev @ w_hh1    (layer-1 gates, this step)
    w_big = jnp.concatenate(
        [jnp.concatenate([w_hh0, w_ih1], axis=1),
         jnp.concatenate([jnp.zeros((H, H4), jnp.float32), w_hh1], axis=1)],
        axis=0).astype(jnp.bfloat16)                                # (2H, 8H)

    b0 = _perm_gates(params["b0"])
    b1 = _perm_gates(params["b1"])

    # Packed f32 slab: rows 0..3 = biases, rows 8.. = fc weights (8-row aligned).
    rows = 8 + H + Hh
    misc = jnp.zeros((rows, H4), jnp.float32)
    misc = misc.at[0, :].set(b0[0])
    misc = misc.at[1, :].set(b1[0])
    misc = misc.at[2, :Hh].set(params["fc1_b"][0])
    misc = misc.at[3, :O].set(params["fc2_b"][0])
    misc = misc.at[8:8 + H, :Hh].set(params["fc1_w"])
    misc = misc.at[8 + H:8 + H + Hh, :O].set(params["fc2_w"])

    return {"w_ih0": w_ih0, "w_big": w_big, "misc": misc,
            "H": int(H), "Hh": int(Hh), "O": int(O)}


def time_series_model(x, prepped):
    """x: (B, T, D) float32; prepped: output of prepare_params()."""
    B, T, D = x.shape
    H, Hh, O = prepped["H"], prepped["Hh"], prepped["O"]

    # Pad batch to a full sublane tile so every per-step slice of the hoisted
    # input projection is an aligned full-row block (no per-step sublane rotates).
    B_pad = max(8, ((B + 7) // 8) * 8)
    x_p = jnp.zeros((B_pad, T, D), x.dtype).at[:B, :, :].set(x)
    # Time-major flatten (row t*B_pad + b); bf16 for the MXU input projection.
    x_tb = jnp.transpose(x_p, (1, 0, 2)).reshape(T * B_pad, D).astype(jnp.bfloat16)

    vmem = pl.BlockSpec(memory_space=pltpu.MemorySpace.VMEM)
    out = pl.pallas_call(
        functools.partial(lstm_fc_kernel, T, H, Hh, O),
        out_shape=jax.ShapeDtypeStruct((B_pad, O), jnp.float32),
        in_specs=[vmem, vmem, vmem, vmem],
        out_specs=vmem,
        scratch_shapes=[pltpu.VMEM((B_pad, 2 * H), jnp.float32)],
    )(x_tb, prepped["w_ih0"], prepped["w_big"], prepped["misc"])
    return out[:B]


def init_params(key, input_size, hidden_size, output_size):
    """Deterministic uniform(-k, k) init, matching PyTorch's shape conventions."""
    ks = jax.random.split(key, 12)
    k_lstm = 1.0 / jnp.sqrt(hidden_size)

    def u(k, shape, scale):
        return jax.random.uniform(k, shape, jnp.float32, -scale, scale)

    H = hidden_size
    params = {
        # layer 0 (PyTorch gate order i, f, g, o; weights pre-transposed)
        "w_ih0": u(ks[0], (input_size, 4 * H), k_lstm),
        "w_hh0": u(ks[1], (H, 4 * H), k_lstm),
        "b0":    u(ks[2], (1, 4 * H), k_lstm) + u(ks[3], (1, 4 * H), k_lstm),
        # layer 1
        "w_ih1": u(ks[4], (H, 4 * H), k_lstm),
        "w_hh1": u(ks[5], (H, 4 * H), k_lstm),
        "b1":    u(ks[6], (1, 4 * H), k_lstm) + u(ks[7], (1, 4 * H), k_lstm),
        # fc head
        "fc1_w": u(ks[8], (H, H // 2), 1.0 / jnp.sqrt(H)),
        "fc1_b": u(ks[9], (1, H // 2), 1.0 / jnp.sqrt(H)),
        "fc2_w": u(ks[10], (H // 2, output_size), 1.0 / jnp.sqrt(H // 2)),
        "fc2_b": u(ks[11], (1, output_size), 1.0 / jnp.sqrt(H // 2)),
    }
    return params


def reference_forward(x, p):
    """Pure-JAX f32 reference in PyTorch layout/gate order (same math)."""
    B, T, D = x.shape
    H = p["w_hh0"].shape[0]

    def cell(x_t, h, c, w_ih, w_hh, b):
        g = x_t @ w_ih + h @ w_hh + b
        i = jax.nn.sigmoid(g[:, :H])
        f = jax.nn.sigmoid(g[:, H:2 * H])
        gg = jnp.tanh(g[:, 2 * H:3 * H])
        o = jax.nn.sigmoid(g[:, 3 * H:])
        c = f * c + i * gg
        return o * jnp.tanh(c), c

    h1 = c1 = h2 = c2 = jnp.zeros((B, H), jnp.float32)
    for t in range(T):
        h1, c1 = cell(x[:, t, :], h1, c1, p["w_ih0"], p["w_hh0"], p["b0"])
        h2, c2 = cell(h1, h2, c2, p["w_ih1"], p["w_hh1"], p["b1"])
    z = jnp.maximum(h2 @ p["fc1_w"] + p["fc1_b"], 0.0)
    return z @ p["fc2_w"] + p["fc2_b"]


if __name__ == "__main__":
    batch, seq, input_size = 2, 8, 4
    hidden_size, output_size = 32, 1

    key = jax.random.PRNGKey(0)
    k_x, k_p = jax.random.split(key)
    x = jax.random.normal(k_x, (batch, seq, input_size), jnp.float32)
    params = init_params(k_p, input_size, hidden_size, output_size)

    prepped = prepare_params(params)                  # one-time prep, off the hot path
    forward = jax.jit(lambda xx: time_series_model(xx, prepped))

    out = jax.block_until_ready(forward(x))
    ref = reference_forward(x, params)
    assert out.shape == (batch, output_size)
    # bf16 MXU operands (f32 accumulate) -> slightly relaxed tolerance vs f32 ref.
    assert jnp.allclose(out, ref, atol=3e-2, rtol=3e-2), (out, ref)
    print("KERNEL_OK")
</pallas_src>

<mosaic_0001>
module attributes {stable_mosaic.version = 11 : i64} {
  func.func @lstm_fc_kernel(%arg0: memref<64x4xbf16, #tpu.memory_space<vmem>>, %arg1: memref<4x128xbf16, #tpu.memory_space<vmem>>, %arg2: memref<64x256xbf16, #tpu.memory_space<vmem>>, %arg3: memref<56x128xf32, #tpu.memory_space<vmem>>, %arg4: memref<8x1xf32, #tpu.memory_space<vmem>>, %arg5: memref<8x64xf32, #tpu.memory_space<vmem>>) attributes {dimension_semantics = [], scalar_prefetch = 0 : i64, scratch_operands = 1 : i64, tpu.core_type = #tpu.core_type<tc>} {
    %c0 = arith.constant 0 : index
    %c0_0 = arith.constant 0 : index
    %0 = vector.load %arg3[%c0, %c0_0] : memref<56x128xf32, #tpu.memory_space<vmem>>, vector<1x128xf32>
    %c1 = arith.constant 1 : index
    %c0_1 = arith.constant 0 : index
    %1 = vector.load %arg3[%c1, %c0_1] : memref<56x128xf32, #tpu.memory_space<vmem>>, vector<1x128xf32>
    %2 = vector.shape_cast %1 : vector<1x128xf32> to vector<1x128xf32>
    %3 = vector.broadcast %2 : vector<1x128xf32> to vector<8x128xf32>
    %c2 = arith.constant 2 : index
    %c0_2 = arith.constant 0 : index
    %4 = vector.load %arg3[%c2, %c0_2] : memref<56x128xf32, #tpu.memory_space<vmem>>, vector<1x16xf32>
    %c3 = arith.constant 3 : index
    %c0_3 = arith.constant 0 : index
    %5 = vector.load %arg3[%c3, %c0_3] : memref<56x128xf32, #tpu.memory_space<vmem>>, vector<1x1xf32>
    %c8 = arith.constant 8 : index
    %c0_4 = arith.constant 0 : index
    %6 = vector.load %arg3[%c8, %c0_4] : memref<56x128xf32, #tpu.memory_space<vmem>>, vector<32x16xf32>
    %c40 = arith.constant 40 : index
    %c0_5 = arith.constant 0 : index
    %7 = vector.load %arg3[%c40, %c0_5] : memref<56x128xf32, #tpu.memory_space<vmem>>, vector<16x1xf32>
    %c0_6 = arith.constant 0 : index
    %c0_7 = arith.constant 0 : index
    %8 = vector.load %arg0[%c0_6, %c0_7] : memref<64x4xbf16, #tpu.memory_space<vmem>>, vector<64x4xbf16>
    %c0_8 = arith.constant 0 : index
    %c0_9 = arith.constant 0 : index
    %9 = vector.load %arg1[%c0_8, %c0_9] : memref<4x128xbf16, #tpu.memory_space<vmem>>, vector<4x128xbf16>
    %cst = arith.constant dense<0.000000e+00> : vector<64x128xf32>
    %10 = tpu.matmul %8, %9, %cst {dimension_numbers = #tpu.dot_dimension_numbers<[1], [0], [0], [1], [0, 0, 1, 1], [], []>} : vector<64x4xbf16>, vector<4x128xbf16>, vector<64x128xf32> -> vector<64x128xf32>
    %11 = vector.broadcast %0 : vector<1x128xf32> to vector<64x128xf32>
    %12 = arith.addf %10, %11 : vector<64x128xf32>
    %c0_10 = arith.constant 0 : index
    %c0_11 = arith.constant 0 : index
    %13 = vector.load %arg2[%c0_10, %c0_11] : memref<64x256xbf16, #tpu.memory_space<vmem>>, vector<64x256xbf16>
    %cst_12 = arith.constant 0.000000e+00 : f32
    %14 = vector.broadcast %cst_12 : f32 to vector<8x64xf32>
    %c0_13 = arith.constant 0 : index
    %c0_14 = arith.constant 0 : index
    %15 = vector.load %arg5[%c0_13, %c0_14] : memref<8x64xf32, #tpu.memory_space<vmem>>, vector<8x64xf32>
    tpu.vector_store %arg5[%c0_13, %c0_14], %14 {strides = array<i32>} : memref<8x64xf32, #tpu.memory_space<vmem>>, vector<8x64xf32>,
    %cst_15 = arith.constant 0.000000e+00 : f32
    %16 = vector.broadcast %cst_15 : f32 to vector<8x32xf32>
    %cst_16 = arith.constant 0.000000e+00 : f32
    %17 = vector.broadcast %cst_16 : f32 to vector<8x32xf32>
    %cst_17 = arith.constant 0.000000e+00 : f32
    %18 = vector.broadcast %cst_17 : f32 to vector<8x128xf32>
    %19 = vector.extract_strided_slice %12 {offsets = [0, 0], sizes = [8, 128], strides = [1, 1]} : vector<64x128xf32> to vector<8x128xf32>
    %20 = arith.addf %19, %18 : vector<8x128xf32>
    %21 = vector.extract_strided_slice %20 {offsets = [0, 0], sizes = [8, 96], strides = [1, 1]} : vector<8x128xf32> to vector<8x96xf32>
    %22 = arith.negf %21 : vector<8x96xf32>
    %23 = math.exp %22 : vector<8x96xf32>
    %cst_18 = arith.constant 1.000000e+00 : f32
    %24 = vector.broadcast %cst_18 : f32 to vector<8x96xf32>
    %25 = arith.addf %24, %23 : vector<8x96xf32>
    %26 = arith.divf %24, %25 : vector<8x96xf32>
    %27 = vector.extract_strided_slice %20 {offsets = [0, 96], sizes = [8, 32], strides = [1, 1]} : vector<8x128xf32> to vector<8x32xf32>
    %28 = math.tanh %27 : vector<8x32xf32>
    %29 = vector.extract_strided_slice %26 {offsets = [0, 0], sizes = [8, 32], strides = [1, 1]} : vector<8x96xf32> to vector<8x32xf32>
    %30 = vector.extract_strided_slice %26 {offsets = [0, 32], sizes = [8, 32], strides = [1, 1]} : vector<8x96xf32> to vector<8x32xf32>
    %31 = vector.extract_strided_slice %26 {offsets = [0, 64], sizes = [8, 32], strides = [1, 1]} : vector<8x96xf32> to vector<8x32xf32>
    %32 = arith.mulf %30, %16 : vector<8x32xf32>
    %33 = arith.mulf %29, %28 : vector<8x32xf32>
    %34 = arith.addf %32, %33 : vector<8x32xf32>
    %35 = math.tanh %34 : vector<8x32xf32>
    %36 = arith.mulf %31, %35 : vector<8x32xf32>
    %c0_19 = arith.constant 0 : index
    %c0_20 = arith.constant 0 : index
    %37 = vector.load %arg5[%c0_19, %c0_20] : memref<8x64xf32, #tpu.memory_space<vmem>>, vector<8x32xf32>
    tpu.vector_store %arg5[%c0_19, %c0_20], %36 {strides = array<i32>} : memref<8x64xf32, #tpu.memory_space<vmem>>, vector<8x32xf32>,
    %c0_21 = arith.constant 0 : index
    %c0_22 = arith.constant 0 : index
    %38 = vector.load %arg5[%c0_21, %c0_22] : memref<8x64xf32, #tpu.memory_space<vmem>>, vector<8x64xf32>
    %39 = arith.truncf %38 : vector<8x64xf32> to vector<8x64xbf16>
    %cst_23 = arith.constant dense<0.000000e+00> : vector<8x256xf32>
    %40 = tpu.matmul %39, %13, %cst_23 {dimension_numbers = #tpu.dot_dimension_numbers<[1], [0], [0], [1], [0, 0, 1, 1], [], []>} : vector<8x64xbf16>, vector<64x256xbf16>, vector<8x256xf32> -> vector<8x256xf32>
    %41 = vector.extract_strided_slice %40 {offsets = [0, 0], sizes = [8, 128], strides = [1, 1]} : vector<8x256xf32> to vector<8x128xf32>
    %42 = vector.extract_strided_slice %40 {offsets = [0, 128], sizes = [8, 128], strides = [1, 1]} : vector<8x256xf32> to vector<8x128xf32>
    %43 = arith.addf %42, %3 : vector<8x128xf32>
    %44 = vector.extract_strided_slice %43 {offsets = [0, 0], sizes = [8, 96], strides = [1, 1]} : vector<8x128xf32> to vector<8x96xf32>
    %45 = arith.negf %44 : vector<8x96xf32>
    %46 = math.exp %45 : vector<8x96xf32>
    %cst_24 = arith.constant 1.000000e+00 : f32
    %47 = vector.broadcast %cst_24 : f32 to vector<8x96xf32>
    %48 = arith.addf %47, %46 : vector<8x96xf32>
    %49 = arith.divf %47, %48 : vector<8x96xf32>
    %50 = vector.extract_strided_slice %43 {offsets = [0, 96], sizes = [8, 32], strides = [1, 1]} : vector<8x128xf32> to vector<8x32xf32>
    %51 = math.tanh %50 : vector<8x32xf32>
    %52 = vector.extract_strided_slice %49 {offsets = [0, 0], sizes = [8, 32], strides = [1, 1]} : vector<8x96xf32> to vector<8x32xf32>
    %53 = vector.extract_strided_slice %49 {offsets = [0, 32], sizes = [8, 32], strides = [1, 1]} : vector<8x96xf32> to vector<8x32xf32>
    %54 = vector.extract_strided_slice %49 {offsets = [0, 64], sizes = [8, 32], strides = [1, 1]} : vector<8x96xf32> to vector<8x32xf32>
    %55 = arith.mulf %53, %17 : vector<8x32xf32>
    %56 = arith.mulf %52, %51 : vector<8x32xf32>
    %57 = arith.addf %55, %56 : vector<8x32xf32>
    %58 = math.tanh %57 : vector<8x32xf32>
    %59 = arith.mulf %54, %58 : vector<8x32xf32>
    %c0_25 = arith.constant 0 : index
    %c32 = arith.constant 32 : index
    %60 = vector.load %arg5[%c0_25, %c32] : memref<8x64xf32, #tpu.memory_space<vmem>>, vector<8x32xf32>
    tpu.vector_store %arg5[%c0_25, %c32], %59 {strides = array<i32>} : memref<8x64xf32, #tpu.memory_space<vmem>>, vector<8x32xf32>,
    %61 = vector.extract_strided_slice %12 {offsets = [8, 0], sizes = [8, 128], strides = [1, 1]} : vector<64x128xf32> to vector<8x128xf32>
    %62 = arith.addf %61, %41 : vector<8x128xf32>
    %63 = vector.extract_strided_slice %62 {offsets = [0, 0], sizes = [8, 96], strides = [1, 1]} : vector<8x128xf32> to vector<8x96xf32>
    %64 = arith.negf %63 : vector<8x96xf32>
    %65 = math.exp %64 : vector<8x96xf32>
    %cst_26 = arith.constant 1.000000e+00 : f32
    %66 = vector.broadcast %cst_26 : f32 to vector<8x96xf32>
    %67 = arith.addf %66, %65 : vector<8x96xf32>
    %68 = arith.divf %66, %67 : vector<8x96xf32>
    %69 = vector.extract_strided_slice %62 {offsets = [0, 96], sizes = [8, 32], strides = [1, 1]} : vector<8x128xf32> to vector<8x32xf32>
    %70 = math.tanh %69 : vector<8x32xf32>
    %71 = vector.extract_strided_slice %68 {offsets = [0, 0], sizes = [8, 32], strides = [1, 1]} : vector<8x96xf32> to vector<8x32xf32>
    %72 = vector.extract_strided_slice %68 {offsets = [0, 32], sizes = [8, 32], strides = [1, 1]} : vector<8x96xf32> to vector<8x32xf32>
    %73 = vector.extract_strided_slice %68 {offsets = [0, 64], sizes = [8, 32], strides = [1, 1]} : vector<8x96xf32> to vector<8x32xf32>
    %74 = arith.mulf %72, %34 : vector<8x32xf32>
    %75 = arith.mulf %71, %70 : vector<8x32xf32>
    %76 = arith.addf %74, %75 : vector<8x32xf32>
    %77 = math.tanh %76 : vector<8x32xf32>
    %78 = arith.mulf %73, %77 : vector<8x32xf32>
    %c0_27 = arith.constant 0 : index
    %c0_28 = arith.constant 0 : index
    %79 = vector.load %arg5[%c0_27, %c0_28] : memref<8x64xf32, #tpu.memory_space<vmem>>, vector<8x32xf32>
    tpu.vector_store %arg5[%c0_27, %c0_28], %78 {strides = array<i32>} : memref<8x64xf32, #tpu.memory_space<vmem>>, vector<8x32xf32>,
    %c0_29 = arith.constant 0 : index
    %c0_30 = arith.constant 0 : index
    %80 = vector.load %arg5[%c0_29, %c0_30] : memref<8x64xf32, #tpu.memory_space<vmem>>, vector<8x64xf32>
    %81 = arith.truncf %80 : vector<8x64xf32> to vector<8x64xbf16>
    %cst_31 = arith.constant dense<0.000000e+00> : vector<8x256xf32>
    %82 = tpu.matmul %81, %13, %cst_31 {dimension_numbers = #tpu.dot_dimension_numbers<[1], [0], [0], [1], [0, 0, 1, 1], [], []>} : vector<8x64xbf16>, vector<64x256xbf16>, vector<8x256xf32> -> vector<8x256xf32>
    %83 = vector.extract_strided_slice %82 {offsets = [0, 0], sizes = [8, 128], strides = [1, 1]} : vector<8x256xf32> to vector<8x128xf32>
    %84 = vector.extract_strided_slice %82 {offsets = [0, 128], sizes = [8, 128], strides = [1, 1]} : vector<8x256xf32> to vector<8x128xf32>
    %85 = arith.addf %84, %3 : vector<8x128xf32>
    %86 = vector.extract_strided_slice %85 {offsets = [0, 0], sizes = [8, 96], strides = [1, 1]} : vector<8x128xf32> to vector<8x96xf32>
    %87 = arith.negf %86 : vector<8x96xf32>
    %88 = math.exp %87 : vector<8x96xf32>
    %cst_32 = arith.constant 1.000000e+00 : f32
    %89 = vector.broadcast %cst_32 : f32 to vector<8x96xf32>
    %90 = arith.addf %89, %88 : vector<8x96xf32>
    %91 = arith.divf %89, %90 : vector<8x96xf32>
    %92 = vector.extract_strided_slice %85 {offsets = [0, 96], sizes = [8, 32], strides = [1, 1]} : vector<8x128xf32> to vector<8x32xf32>
    %93 = math.tanh %92 : vector<8x32xf32>
    %94 = vector.extract_strided_slice %91 {offsets = [0, 0], sizes = [8, 32], strides = [1, 1]} : vector<8x96xf32> to vector<8x32xf32>
    %95 = vector.extract_strided_slice %91 {offsets = [0, 32], sizes = [8, 32], strides = [1, 1]} : vector<8x96xf32> to vector<8x32xf32>
    %96 = vector.extract_strided_slice %91 {offsets = [0, 64], sizes = [8, 32], strides = [1, 1]} : vector<8x96xf32> to vector<8x32xf32>
    %97 = arith.mulf %95, %57 : vector<8x32xf32>
    %98 = arith.mulf %94, %93 : vector<8x32xf32>
    %99 = arith.addf %97, %98 : vector<8x32xf32>
    %100 = math.tanh %99 : vector<8x32xf32>
    %101 = arith.mulf %96, %100 : vector<8x32xf32>
    %c0_33 = arith.constant 0 : index
    %c32_34 = arith.constant 32 : index
    %102 = vector.load %arg5[%c0_33, %c32_34] : memref<8x64xf32, #tpu.memory_space<vmem>>, vector<8x32xf32>
    tpu.vector_store %arg5[%c0_33, %c32_34], %101 {strides = array<i32>} : memref<8x64xf32, #tpu.memory_space<vmem>>, vector<8x32xf32>,
    %103 = vector.extract_strided_slice %12 {offsets = [16, 0], sizes = [8, 128], strides = [1, 1]} : vector<64x128xf32> to vector<8x128xf32>
    %104 = arith.addf %103, %83 : vector<8x128xf32>
    %105 = vector.extract_strided_slice %104 {offsets = [0, 0], sizes = [8, 96], strides = [1, 1]} : vector<8x128xf32> to vector<8x96xf32>
    %106 = arith.negf %105 : vector<8x96xf32>
    %107 = math.exp %106 : vector<8x96xf32>
    %cst_35 = arith.constant 1.000000e+00 : f32
    %108 = vector.broadcast %cst_35 : f32 to vector<8x96xf32>
    %109 = arith.addf %108, %107 : vector<8x96xf32>
    %110 = arith.divf %108, %109 : vector<8x96xf32>
    %111 = vector.extract_strided_slice %104 {offsets = [0, 96], sizes = [8, 32], strides = [1, 1]} : vector<8x128xf32> to vector<8x32xf32>
    %112 = math.tanh %111 : vector<8x32xf32>
    %113 = vector.extract_strided_slice %110 {offsets = [0, 0], sizes = [8, 32], strides = [1, 1]} : vector<8x96xf32> to vector<8x32xf32>
    %114 = vector.extract_strided_slice %110 {offsets = [0, 32], sizes = [8, 32], strides = [1, 1]} : vector<8x96xf32> to vector<8x32xf32>
    %115 = vector.extract_strided_slice %110 {offsets = [0, 64], sizes = [8, 32], strides = [1, 1]} : vector<8x96xf32> to vector<8x32xf32>
    %116 = arith.mulf %114, %76 : vector<8x32xf32>
    %117 = arith.mulf %113, %112 : vector<8x32xf32>
    %118 = arith.addf %116, %117 : vector<8x32xf32>
    %119 = math.tanh %118 : vector<8x32xf32>
    %120 = arith.mulf %115, %119 : vector<8x32xf32>
    %c0_36 = arith.constant 0 : index
    %c0_37 = arith.constant 0 : index
    %121 = vector.load %arg5[%c0_36, %c0_37] : memref<8x64xf32, #tpu.memory_space<vmem>>, vector<8x32xf32>
    tpu.vector_store %arg5[%c0_36, %c0_37], %120 {strides = array<i32>} : memref<8x64xf32, #tpu.memory_space<vmem>>, vector<8x32xf32>,
    %c0_38 = arith.constant 0 : index
    %c0_39 = arith.constant 0 : index
    %122 = vector.load %arg5[%c0_38, %c0_39] : memref<8x64xf32, #tpu.memory_space<vmem>>, vector<8x64xf32>
    %123 = arith.truncf %122 : vector<8x64xf32> to vector<8x64xbf16>
    %cst_40 = arith.constant dense<0.000000e+00> : vector<8x256xf32>
    %124 = tpu.matmul %123, %13, %cst_40 {dimension_numbers = #tpu.dot_dimension_numbers<[1], [0], [0], [1], [0, 0, 1, 1], [], []>} : vector<8x64xbf16>, vector<64x256xbf16>, vector<8x256xf32> -> vector<8x256xf32>
    %125 = vector.extract_strided_slice %124 {offsets = [0, 0], sizes = [8, 128], strides = [1, 1]} : vector<8x256xf32> to vector<8x128xf32>
    %126 = vector.extract_strided_slice %124 {offsets = [0, 128], sizes = [8, 128], strides = [1, 1]} : vector<8x256xf32> to vector<8x128xf32>
    %127 = arith.addf %126, %3 : vector<8x128xf32>
    %128 = vector.extract_strided_slice %127 {offsets = [0, 0], sizes = [8, 96], strides = [1, 1]} : vector<8x128xf32> to vector<8x96xf32>
    %129 = arith.negf %128 : vector<8x96xf32>
    %130 = math.exp %129 : vector<8x96xf32>
    %cst_41 = arith.constant 1.000000e+00 : f32
    %131 = vector.broadcast %cst_41 : f32 to vector<8x96xf32>
    %132 = arith.addf %131, %130 : vector<8x96xf32>
    %133 = arith.divf %131, %132 : vector<8x96xf32>
    %134 = vector.extract_strided_slice %127 {offsets = [0, 96], sizes = [8, 32], strides = [1, 1]} : vector<8x128xf32> to vector<8x32xf32>
    %135 = math.tanh %134 : vector<8x32xf32>
    %136 = vector.extract_strided_slice %133 {offsets = [0, 0], sizes = [8, 32], strides = [1, 1]} : vector<8x96xf32> to vector<8x32xf32>
    %137 = vector.extract_strided_slice %133 {offsets = [0, 32], sizes = [8, 32], strides = [1, 1]} : vector<8x96xf32> to vector<8x32xf32>
    %138 = vector.extract_strided_slice %133 {offsets = [0, 64], sizes = [8, 32], strides = [1, 1]} : vector<8x96xf32> to vector<8x32xf32>
    %139 = arith.mulf %137, %99 : vector<8x32xf32>
    %140 = arith.mulf %136, %135 : vector<8x32xf32>
    %141 = arith.addf %139, %140 : vector<8x32xf32>
    %142 = math.tanh %141 : vector<8x32xf32>
    %143 = arith.mulf %138, %142 : vector<8x32xf32>
    %c0_42 = arith.constant 0 : index
    %c32_43 = arith.constant 32 : index
    %144 = vector.load %arg5[%c0_42, %c32_43] : memref<8x64xf32, #tpu.memory_space<vmem>>, vector<8x32xf32>
    tpu.vector_store %arg5[%c0_42, %c32_43], %143 {strides = array<i32>} : memref<8x64xf32, #tpu.memory_space<vmem>>, vector<8x32xf32>,
    %145 = vector.extract_strided_slice %12 {offsets = [24, 0], sizes = [8, 128], strides = [1, 1]} : vector<64x128xf32> to vector<8x128xf32>
    %146 = arith.addf %145, %125 : vector<8x128xf32>
    %147 = vector.extract_strided_slice %146 {offsets = [0, 0], sizes = [8, 96], strides = [1, 1]} : vector<8x128xf32> to vector<8x96xf32>
    %148 = arith.negf %147 : vector<8x96xf32>
    %149 = math.exp %148 : vector<8x96xf32>
    %cst_44 = arith.constant 1.000000e+00 : f32
    %150 = vector.broadcast %cst_44 : f32 to vector<8x96xf32>
    %151 = arith.addf %150, %149 : vector<8x96xf32>
    %152 = arith.divf %150, %151 : vector<8x96xf32>
    %153 = vector.extract_strided_slice %146 {offsets = [0, 96], sizes = [8, 32], strides = [1, 1]} : vector<8x128xf32> to vector<8x32xf32>
    %154 = math.tanh %153 : vector<8x32xf32>
    %155 = vector.extract_strided_slice %152 {offsets = [0, 0], sizes = [8, 32], strides = [1, 1]} : vector<8x96xf32> to vector<8x32xf32>
    %156 = vector.extract_strided_slice %152 {offsets = [0, 32], sizes = [8, 32], strides = [1, 1]} : vector<8x96xf32> to vector<8x32xf32>
    %157 = vector.extract_strided_slice %152 {offsets = [0, 64], sizes = [8, 32], strides = [1, 1]} : vector<8x96xf32> to vector<8x32xf32>
    %158 = arith.mulf %156, %118 : vector<8x32xf32>
    %159 = arith.mulf %155, %154 : vector<8x32xf32>
    %160 = arith.addf %158, %159 : vector<8x32xf32>
    %161 = math.tanh %160 : vector<8x32xf32>
    %162 = arith.mulf %157, %161 : vector<8x32xf32>
    %c0_45 = arith.constant 0 : index
    %c0_46 = arith.constant 0 : index
    %163 = vector.load %arg5[%c0_45, %c0_46] : memref<8x64xf32, #tpu.memory_space<vmem>>, vector<8x32xf32>
    tpu.vector_store %arg5[%c0_45, %c0_46], %162 {strides = array<i32>} : memref<8x64xf32, #tpu.memory_space<vmem>>, vector<8x32xf32>,
    %c0_47 = arith.constant 0 : index
    %c0_48 = arith.constant 0 : index
    %164 = vector.load %arg5[%c0_47, %c0_48] : memref<8x64xf32, #tpu.memory_space<vmem>>, vector<8x64xf32>
    %165 = arith.truncf %164 : vector<8x64xf32> to vector<8x64xbf16>
    %cst_49 = arith.constant dense<0.000000e+00> : vector<8x256xf32>
    %166 = tpu.matmul %165, %13, %cst_49 {dimension_numbers = #tpu.dot_dimension_numbers<[1], [0], [0], [1], [0, 0, 1, 1], [], []>} : vector<8x64xbf16>, vector<64x256xbf16>, vector<8x256xf32> -> vector<8x256xf32>
    %167 = vector.extract_strided_slice %166 {offsets = [0, 0], sizes = [8, 128], strides = [1, 1]} : vector<8x256xf32> to vector<8x128xf32>
    %168 = vector.extract_strided_slice %166 {offsets = [0, 128], sizes = [8, 128], strides = [1, 1]} : vector<8x256xf32> to vector<8x128xf32>
    %169 = arith.addf %168, %3 : vector<8x128xf32>
    %170 = vector.extract_strided_slice %169 {offsets = [0, 0], sizes = [8, 96], strides = [1, 1]} : vector<8x128xf32> to vector<8x96xf32>
    %171 = arith.negf %170 : vector<8x96xf32>
    %172 = math.exp %171 : vector<8x96xf32>
    %cst_50 = arith.constant 1.000000e+00 : f32
    %173 = vector.broadcast %cst_50 : f32 to vector<8x96xf32>
    %174 = arith.addf %173, %172 : vector<8x96xf32>
    %175 = arith.divf %173, %174 : vector<8x96xf32>
    %176 = vector.extract_strided_slice %169 {offsets = [0, 96], sizes = [8, 32], strides = [1, 1]} : vector<8x128xf32> to vector<8x32xf32>
    %177 = math.tanh %176 : vector<8x32xf32>
    %178 = vector.extract_strided_slice %175 {offsets = [0, 0], sizes = [8, 32], strides = [1, 1]} : vector<8x96xf32> to vector<8x32xf32>
    %179 = vector.extract_strided_slice %175 {offsets = [0, 32], sizes = [8, 32], strides = [1, 1]} : vector<8x96xf32> to vector<8x32xf32>
    %180 = vector.extract_strided_slice %175 {offsets = [0, 64], sizes = [8, 32], strides = [1, 1]} : vector<8x96xf32> to vector<8x32xf32>
    %181 = arith.mulf %179, %141 : vector<8x32xf32>
    %182 = arith.mulf %178, %177 : vector<8x32xf32>
    %183 = arith.addf %181, %182 : vector<8x32xf32>
    %184 = math.tanh %183 : vector<8x32xf32>
    %185 = arith.mulf %180, %184 : vector<8x32xf32>
    %c0_51 = arith.constant 0 : index
    %c32_52 = arith.constant 32 : index
    %186 = vector.load %arg5[%c0_51, %c32_52] : memref<8x64xf32, #tpu.memory_space<vmem>>, vector<8x32xf32>
    tpu.vector_store %arg5[%c0_51, %c32_52], %185 {strides = array<i32>} : memref<8x64xf32, #tpu.memory_space<vmem>>, vector<8x32xf32>,
    %187 = vector.extract_strided_slice %12 {offsets = [32, 0], sizes = [8, 128], strides = [1, 1]} : vector<64x128xf32> to vector<8x128xf32>
    %188 = arith.addf %187, %167 : vector<8x128xf32>
    %189 = vector.extract_strided_slice %188 {offsets = [0, 0], sizes = [8, 96], strides = [1, 1]} : vector<8x128xf32> to vector<8x96xf32>
    %190 = arith.negf %189 : vector<8x96xf32>
    %191 = math.exp %190 : vector<8x96xf32>
    %cst_53 = arith.constant 1.000000e+00 : f32
    %192 = vector.broadcast %cst_53 : f32 to vector<8x96xf32>
    %193 = arith.addf %192, %191 : vector<8x96xf32>
    %194 = arith.divf %192, %193 : vector<8x96xf32>
    %195 = vector.extract_strided_slice %188 {offsets = [0, 96], sizes = [8, 32], strides = [1, 1]} : vector<8x128xf32> to vector<8x32xf32>
    %196 = math.tanh %195 : vector<8x32xf32>
    %197 = vector.extract_strided_slice %194 {offsets = [0, 0], sizes = [8, 32], strides = [1, 1]} : vector<8x96xf32> to vector<8x32xf32>
    %198 = vector.extract_strided_slice %194 {offsets = [0, 32], sizes = [8, 32], strides = [1, 1]} : vector<8x96xf32> to vector<8x32xf32>
    %199 = vector.extract_strided_slice %194 {offsets = [0, 64], sizes = [8, 32], strides = [1, 1]} : vector<8x96xf32> to vector<8x32xf32>
    %200 = arith.mulf %198, %160 : vector<8x32xf32>
    %201 = arith.mulf %197, %196 : vector<8x32xf32>
    %202 = arith.addf %200, %201 : vector<8x32xf32>
    %203 = math.tanh %202 : vector<8x32xf32>
    %204 = arith.mulf %199, %203 : vector<8x32xf32>
    %c0_54 = arith.constant 0 : index
    %c0_55 = arith.constant 0 : index
    %205 = vector.load %arg5[%c0_54, %c0_55] : memref<8x64xf32, #tpu.memory_space<vmem>>, vector<8x32xf32>
    tpu.vector_store %arg5[%c0_54, %c0_55], %204 {strides = array<i32>} : memref<8x64xf32, #tpu.memory_space<vmem>>, vector<8x32xf32>,
    %c0_56 = arith.constant 0 : index
    %c0_57 = arith.constant 0 : index
    %206 = vector.load %arg5[%c0_56, %c0_57] : memref<8x64xf32, #tpu.memory_space<vmem>>, vector<8x64xf32>
    %207 = arith.truncf %206 : vector<8x64xf32> to vector<8x64xbf16>
    %cst_58 = arith.constant dense<0.000000e+00> : vector<8x256xf32>
    %208 = tpu.matmul %207, %13, %cst_58 {dimension_numbers = #tpu.dot_dimension_numbers<[1], [0], [0], [1], [0, 0, 1, 1], [], []>} : vector<8x64xbf16>, vector<64x256xbf16>, vector<8x256xf32> -> vector<8x256xf32>
    %209 = vector.extract_strided_slice %208 {offsets = [0, 0], sizes = [8, 128], strides = [1, 1]} : vector<8x256xf32> to vector<8x128xf32>
    %210 = vector.extract_strided_slice %208 {offsets = [0, 128], sizes = [8, 128], strides = [1, 1]} : vector<8x256xf32> to vector<8x128xf32>
    %211 = arith.addf %210, %3 : vector<8x128xf32>
    %212 = vector.extract_strided_slice %211 {offsets = [0, 0], sizes = [8, 96], strides = [1, 1]} : vector<8x128xf32> to vector<8x96xf32>
    %213 = arith.negf %212 : vector<8x96xf32>
    %214 = math.exp %213 : vector<8x96xf32>
    %cst_59 = arith.constant 1.000000e+00 : f32
    %215 = vector.broadcast %cst_59 : f32 to vector<8x96xf32>
    %216 = arith.addf %215, %214 : vector<8x96xf32>
    %217 = arith.divf %215, %216 : vector<8x96xf32>
    %218 = vector.extract_strided_slice %211 {offsets = [0, 96], sizes = [8, 32], strides = [1, 1]} : vector<8x128xf32> to vector<8x32xf32>
    %219 = math.tanh %218 : vector<8x32xf32>
    %220 = vector.extract_strided_slice %217 {offsets = [0, 0], sizes = [8, 32], strides = [1, 1]} : vector<8x96xf32> to vector<8x32xf32>
    %221 = vector.extract_strided_slice %217 {offsets = [0, 32], sizes = [8, 32], strides = [1, 1]} : vector<8x96xf32> to vector<8x32xf32>
    %222 = vector.extract_strided_slice %217 {offsets = [0, 64], sizes = [8, 32], strides = [1, 1]} : vector<8x96xf32> to vector<8x32xf32>
    %223 = arith.mulf %221, %183 : vector<8x32xf32>
    %224 = arith.mulf %220, %219 : vector<8x32xf32>
    %225 = arith.addf %223, %224 : vector<8x32xf32>
    %226 = math.tanh %225 : vector<8x32xf32>
    %227 = arith.mulf %222, %226 : vector<8x32xf32>
    %c0_60 = arith.constant 0 : index
    %c32_61 = arith.constant 32 : index
    %228 = vector.load %arg5[%c0_60, %c32_61] : memref<8x64xf32, #tpu.memory_space<vmem>>, vector<8x32xf32>
    tpu.vector_store %arg5[%c0_60, %c32_61], %227 {strides = array<i32>} : memref<8x64xf32, #tpu.memory_space<vmem>>, vector<8x32xf32>,
    %229 = vector.extract_strided_slice %12 {offsets = [40, 0], sizes = [8, 128], strides = [1, 1]} : vector<64x128xf32> to vector<8x128xf32>
    %230 = arith.addf %229, %209 : vector<8x128xf32>
    %231 = vector.extract_strided_slice %230 {offsets = [0, 0], sizes = [8, 96], strides = [1, 1]} : vector<8x128xf32> to vector<8x96xf32>
    %232 = arith.negf %231 : vector<8x96xf32>
    %233 = math.exp %232 : vector<8x96xf32>
    %cst_62 = arith.constant 1.000000e+00 : f32
    %234 = vector.broadcast %cst_62 : f32 to vector<8x96xf32>
    %235 = arith.addf %234, %233 : vector<8x96xf32>
    %236 = arith.divf %234, %235 : vector<8x96xf32>
    %237 = vector.extract_strided_slice %230 {offsets = [0, 96], sizes = [8, 32], strides = [1, 1]} : vector<8x128xf32> to vector<8x32xf32>
    %238 = math.tanh %237 : vector<8x32xf32>
    %239 = vector.extract_strided_slice %236 {offsets = [0, 0], sizes = [8, 32], strides = [1, 1]} : vector<8x96xf32> to vector<8x32xf32>
    %240 = vector.extract_strided_slice %236 {offsets = [0, 32], sizes = [8, 32], strides = [1, 1]} : vector<8x96xf32> to vector<8x32xf32>
    %241 = vector.extract_strided_slice %236 {offsets = [0, 64], sizes = [8, 32], strides = [1, 1]} : vector<8x96xf32> to vector<8x32xf32>
    %242 = arith.mulf %240, %202 : vector<8x32xf32>
    %243 = arith.mulf %239, %238 : vector<8x32xf32>
    %244 = arith.addf %242, %243 : vector<8x32xf32>
    %245 = math.tanh %244 : vector<8x32xf32>
    %246 = arith.mulf %241, %245 : vector<8x32xf32>
    %c0_63 = arith.constant 0 : index
    %c0_64 = arith.constant 0 : index
    %247 = vector.load %arg5[%c0_63, %c0_64] : memref<8x64xf32, #tpu.memory_space<vmem>>, vector<8x32xf32>
    tpu.vector_store %arg5[%c0_63, %c0_64], %246 {strides = array<i32>} : memref<8x64xf32, #tpu.memory_space<vmem>>, vector<8x32xf32>,
    %c0_65 = arith.constant 0 : index
    %c0_66 = arith.constant 0 : index
    %248 = vector.load %arg5[%c0_65, %c0_66] : memref<8x64xf32, #tpu.memory_space<vmem>>, vector<8x64xf32>
    %249 = arith.truncf %248 : vector<8x64xf32> to vector<8x64xbf16>
    %cst_67 = arith.constant dense<0.000000e+00> : vector<8x256xf32>
    %250 = tpu.matmul %249, %13, %cst_67 {dimension_numbers = #tpu.dot_dimension_numbers<[1], [0], [0], [1], [0, 0, 1, 1], [], []>} : vector<8x64xbf16>, vector<64x256xbf16>, vector<8x256xf32> -> vector<8x256xf32>
    %251 = vector.extract_strided_slice %250 {offsets = [0, 0], sizes = [8, 128], strides = [1, 1]} : vector<8x256xf32> to vector<8x128xf32>
    %252 = vector.extract_strided_slice %250 {offsets = [0, 128], sizes = [8, 128], strides = [1, 1]} : vector<8x256xf32> to vector<8x128xf32>
    %253 = arith.addf %252, %3 : vector<8x128xf32>
    %254 = vector.extract_strided_slice %253 {offsets = [0, 0], sizes = [8, 96], strides = [1, 1]} : vector<8x128xf32> to vector<8x96xf32>
    %255 = arith.negf %254 : vector<8x96xf32>
    %256 = math.exp %255 : vector<8x96xf32>
    %cst_68 = arith.constant 1.000000e+00 : f32
    %257 = vector.broadcast %cst_68 : f32 to vector<8x96xf32>
    %258 = arith.addf %257, %256 : vector<8x96xf32>
    %259 = arith.divf %257, %258 : vector<8x96xf32>
    %260 = vector.extract_strided_slice %253 {offsets = [0, 96], sizes = [8, 32], strides = [1, 1]} : vector<8x128xf32> to vector<8x32xf32>
    %261 = math.tanh %260 : vector<8x32xf32>
    %262 = vector.extract_strided_slice %259 {offsets = [0, 0], sizes = [8, 32], strides = [1, 1]} : vector<8x96xf32> to vector<8x32xf32>
    %263 = vector.extract_strided_slice %259 {offsets = [0, 32], sizes = [8, 32], strides = [1, 1]} : vector<8x96xf32> to vector<8x32xf32>
    %264 = vector.extract_strided_slice %259 {offsets = [0, 64], sizes = [8, 32], strides = [1, 1]} : vector<8x96xf32> to vector<8x32xf32>
    %265 = arith.mulf %263, %225 : vector<8x32xf32>
    %266 = arith.mulf %262, %261 : vector<8x32xf32>
    %267 = arith.addf %265, %266 : vector<8x32xf32>
    %268 = math.tanh %267 : vector<8x32xf32>
    %269 = arith.mulf %264, %268 : vector<8x32xf32>
    %c0_69 = arith.constant 0 : index
    %c32_70 = arith.constant 32 : index
    %270 = vector.load %arg5[%c0_69, %c32_70] : memref<8x64xf32, #tpu.memory_space<vmem>>, vector<8x32xf32>
    tpu.vector_store %arg5[%c0_69, %c32_70], %269 {strides = array<i32>} : memref<8x64xf32, #tpu.memory_space<vmem>>, vector<8x32xf32>,
    %271 = vector.extract_strided_slice %12 {offsets = [48, 0], sizes = [8, 128], strides = [1, 1]} : vector<64x128xf32> to vector<8x128xf32>
    %272 = arith.addf %271, %251 : vector<8x128xf32>
    %273 = vector.extract_strided_slice %272 {offsets = [0, 0], sizes = [8, 96], strides = [1, 1]} : vector<8x128xf32> to vector<8x96xf32>
    %274 = arith.negf %273 : vector<8x96xf32>
    %275 = math.exp %274 : vector<8x96xf32>
    %cst_71 = arith.constant 1.000000e+00 : f32
    %276 = vector.broadcast %cst_71 : f32 to vector<8x96xf32>
    %277 = arith.addf %276, %275 : vector<8x96xf32>
    %278 = arith.divf %276, %277 : vector<8x96xf32>
    %279 = vector.extract_strided_slice %272 {offsets = [0, 96], sizes = [8, 32], strides = [1, 1]} : vector<8x128xf32> to vector<8x32xf32>
    %280 = math.tanh %279 : vector<8x32xf32>
    %281 = vector.extract_strided_slice %278 {offsets = [0, 0], sizes = [8, 32], strides = [1, 1]} : vector<8x96xf32> to vector<8x32xf32>
    %282 = vector.extract_strided_slice %278 {offsets = [0, 32], sizes = [8, 32], strides = [1, 1]} : vector<8x96xf32> to vector<8x32xf32>
    %283 = vector.extract_strided_slice %278 {offsets = [0, 64], sizes = [8, 32], strides = [1, 1]} : vector<8x96xf32> to vector<8x32xf32>
    %284 = arith.mulf %282, %244 : vector<8x32xf32>
    %285 = arith.mulf %281, %280 : vector<8x32xf32>
    %286 = arith.addf %284, %285 : vector<8x32xf32>
    %287 = math.tanh %286 : vector<8x32xf32>
    %288 = arith.mulf %283, %287 : vector<8x32xf32>
    %c0_72 = arith.constant 0 : index
    %c0_73 = arith.constant 0 : index
    %289 = vector.load %arg5[%c0_72, %c0_73] : memref<8x64xf32, #tpu.memory_space<vmem>>, vector<8x32xf32>
    tpu.vector_store %arg5[%c0_72, %c0_73], %288 {strides = array<i32>} : memref<8x64xf32, #tpu.memory_space<vmem>>, vector<8x32xf32>,
    %c0_74 = arith.constant 0 : index
    %c0_75 = arith.constant 0 : index
    %290 = vector.load %arg5[%c0_74, %c0_75] : memref<8x64xf32, #tpu.memory_space<vmem>>, vector<8x64xf32>
    %291 = arith.truncf %290 : vector<8x64xf32> to vector<8x64xbf16>
    %cst_76 = arith.constant dense<0.000000e+00> : vector<8x256xf32>
    %292 = tpu.matmul %291, %13, %cst_76 {dimension_numbers = #tpu.dot_dimension_numbers<[1], [0], [0], [1], [0, 0, 1, 1], [], []>} : vector<8x64xbf16>, vector<64x256xbf16>, vector<8x256xf32> -> vector<8x256xf32>
    %293 = vector.extract_strided_slice %292 {offsets = [0, 0], sizes = [8, 128], strides = [1, 1]} : vector<8x256xf32> to vector<8x128xf32>
    %294 = vector.extract_strided_slice %292 {offsets = [0, 128], sizes = [8, 128], strides = [1, 1]} : vector<8x256xf32> to vector<8x128xf32>
    %295 = arith.addf %294, %3 : vector<8x128xf32>
    %296 = vector.extract_strided_slice %295 {offsets = [0, 0], sizes = [8, 96], strides = [1, 1]} : vector<8x128xf32> to vector<8x96xf32>
    %297 = arith.negf %296 : vector<8x96xf32>
    %298 = math.exp %297 : vector<8x96xf32>
    %cst_77 = arith.constant 1.000000e+00 : f32
    %299 = vector.broadcast %cst_77 : f32 to vector<8x96xf32>
    %300 = arith.addf %299, %298 : vector<8x96xf32>
    %301 = arith.divf %299, %300 : vector<8x96xf32>
    %302 = vector.extract_strided_slice %295 {offsets = [0, 96], sizes = [8, 32], strides = [1, 1]} : vector<8x128xf32> to vector<8x32xf32>
    %303 = math.tanh %302 : vector<8x32xf32>
    %304 = vector.extract_strided_slice %301 {offsets = [0, 0], sizes = [8, 32], strides = [1, 1]} : vector<8x96xf32> to vector<8x32xf32>
    %305 = vector.extract_strided_slice %301 {offsets = [0, 32], sizes = [8, 32], strides = [1, 1]} : vector<8x96xf32> to vector<8x32xf32>
    %306 = vector.extract_strided_slice %301 {offsets = [0, 64], sizes = [8, 32], strides = [1, 1]} : vector<8x96xf32> to vector<8x32xf32>
    %307 = arith.mulf %305, %267 : vector<8x32xf32>
    %308 = arith.mulf %304, %303 : vector<8x32xf32>
    %309 = arith.addf %307, %308 : vector<8x32xf32>
    %310 = math.tanh %309 : vector<8x32xf32>
    %311 = arith.mulf %306, %310 : vector<8x32xf32>
    %c0_78 = arith.constant 0 : index
    %c32_79 = arith.constant 32 : index
    %312 = vector.load %arg5[%c0_78, %c32_79] : memref<8x64xf32, #tpu.memory_space<vmem>>, vector<8x32xf32>
    tpu.vector_store %arg5[%c0_78, %c32_79], %311 {strides = array<i32>} : memref<8x64xf32, #tpu.memory_space<vmem>>, vector<8x32xf32>,
    %313 = vector.extract_strided_slice %12 {offsets = [56, 0], sizes = [8, 128], strides = [1, 1]} : vector<64x128xf32> to vector<8x128xf32>
    %314 = arith.addf %313, %293 : vector<8x128xf32>
    %315 = vector.extract_strided_slice %314 {offsets = [0, 0], sizes = [8, 96], strides = [1, 1]} : vector<8x128xf32> to vector<8x96xf32>
    %316 = arith.negf %315 : vector<8x96xf32>
    %317 = math.exp %316 : vector<8x96xf32>
    %cst_80 = arith.constant 1.000000e+00 : f32
    %318 = vector.broadcast %cst_80 : f32 to vector<8x96xf32>
    %319 = arith.addf %318, %317 : vector<8x96xf32>
    %320 = arith.divf %318, %319 : vector<8x96xf32>
    %321 = vector.extract_strided_slice %314 {offsets = [0, 96], sizes = [8, 32], strides = [1, 1]} : vector<8x128xf32> to vector<8x32xf32>
    %322 = math.tanh %321 : vector<8x32xf32>
    %323 = vector.extract_strided_slice %320 {offsets = [0, 0], sizes = [8, 32], strides = [1, 1]} : vector<8x96xf32> to vector<8x32xf32>
    %324 = vector.extract_strided_slice %320 {offsets = [0, 32], sizes = [8, 32], strides = [1, 1]} : vector<8x96xf32> to vector<8x32xf32>
    %325 = vector.extract_strided_slice %320 {offsets = [0, 64], sizes = [8, 32], strides = [1, 1]} : vector<8x96xf32> to vector<8x32xf32>
    %326 = arith.mulf %324, %286 : vector<8x32xf32>
    %327 = arith.mulf %323, %322 : vector<8x32xf32>
    %328 = arith.addf %326, %327 : vector<8x32xf32>
    %329 = math.tanh %328 : vector<8x32xf32>
    %330 = arith.mulf %325, %329 : vector<8x32xf32>
    %c0_81 = arith.constant 0 : index
    %c0_82 = arith.constant 0 : index
    %331 = vector.load %arg5[%c0_81, %c0_82] : memref<8x64xf32, #tpu.memory_space<vmem>>, vector<8x32xf32>
    tpu.vector_store %arg5[%c0_81, %c0_82], %330 {strides = array<i32>} : memref<8x64xf32, #tpu.memory_space<vmem>>, vector<8x32xf32>,
    %c0_83 = arith.constant 0 : index
    %c0_84 = arith.constant 0 : index
    %332 = vector.load %arg5[%c0_83, %c0_84] : memref<8x64xf32, #tpu.memory_space<vmem>>, vector<8x64xf32>
    %333 = arith.truncf %332 : vector<8x64xf32> to vector<8x64xbf16>
    %cst_85 = arith.constant dense<0.000000e+00> : vector<8x256xf32>
    %334 = tpu.matmul %333, %13, %cst_85 {dimension_numbers = #tpu.dot_dimension_numbers<[1], [0], [0], [1], [0, 0, 1, 1], [], []>} : vector<8x64xbf16>, vector<64x256xbf16>, vector<8x256xf32> -> vector<8x256xf32>
    %335 = vector.extract_strided_slice %334 {offsets = [0, 128], sizes = [8, 128], strides = [1, 1]} : vector<8x256xf32> to vector<8x128xf32>
    %336 = arith.addf %335, %3 : vector<8x128xf32>
    %337 = vector.extract_strided_slice %336 {offsets = [0, 0], sizes = [8, 96], strides = [1, 1]} : vector<8x128xf32> to vector<8x96xf32>
    %338 = arith.negf %337 : vector<8x96xf32>
    %339 = math.exp %338 : vector<8x96xf32>
    %cst_86 = arith.constant 1.000000e+00 : f32
    %340 = vector.broadcast %cst_86 : f32 to vector<8x96xf32>
    %341 = arith.addf %340, %339 : vector<8x96xf32>
    %342 = arith.divf %340, %341 : vector<8x96xf32>
    %343 = vector.extract_strided_slice %336 {offsets = [0, 96], sizes = [8, 32], strides = [1, 1]} : vector<8x128xf32> to vector<8x32xf32>
    %344 = math.tanh %343 : vector<8x32xf32>
    %345 = vector.extract_strided_slice %342 {offsets = [0, 0], sizes = [8, 32], strides = [1, 1]} : vector<8x96xf32> to vector<8x32xf32>
    %346 = vector.extract_strided_slice %342 {offsets = [0, 32], sizes = [8, 32], strides = [1, 1]} : vector<8x96xf32> to vector<8x32xf32>
    %347 = vector.extract_strided_slice %342 {offsets = [0, 64], sizes = [8, 32], strides = [1, 1]} : vector<8x96xf32> to vector<8x32xf32>
    %348 = arith.mulf %346, %309 : vector<8x32xf32>
    %349 = arith.mulf %345, %344 : vector<8x32xf32>
    %350 = arith.addf %348, %349 : vector<8x32xf32>
    %351 = math.tanh %350 : vector<8x32xf32>
    %352 = arith.mulf %347, %351 : vector<8x32xf32>
    %c0_87 = arith.constant 0 : index
    %c32_88 = arith.constant 32 : index
    %353 = vector.load %arg5[%c0_87, %c32_88] : memref<8x64xf32, #tpu.memory_space<vmem>>, vector<8x32xf32>
    tpu.vector_store %arg5[%c0_87, %c32_88], %352 {strides = array<i32>} : memref<8x64xf32, #tpu.memory_space<vmem>>, vector<8x32xf32>,
    %cst_89 = arith.constant dense<0.000000e+00> : vector<8x16xf32>
    %354 = tpu.matmul %352, %6, %cst_89 {dimension_numbers = #tpu.dot_dimension_numbers<[1], [0], [0], [1], [0, 0, 1, 1], [], []>} : vector<8x32xf32>, vector<32x16xf32>, vector<8x16xf32> -> vector<8x16xf32>
    %355 = vector.broadcast %4 : vector<1x16xf32> to vector<8x16xf32>
    %356 = arith.addf %354, %355 : vector<8x16xf32>
    %cst_90 = arith.constant 0.000000e+00 : f32
    %357 = vector.broadcast %cst_90 : f32 to vector<8x16xf32>
    %358 = arith.maximumf %356, %357 : vector<8x16xf32>
    %cst_91 = arith.constant dense<0.000000e+00> : vector<8x1xf32>
    %359 = tpu.matmul %358, %7, %cst_91 {dimension_numbers = #tpu.dot_dimension_numbers<[1], [0], [0], [1], [0, 0, 1, 1], [], []>} : vector<8x16xf32>, vector<16x1xf32>, vector<8x1xf32> -> vector<8x1xf32>
    %360 = vector.broadcast %5 : vector<1x1xf32> to vector<8x1xf32>
    %361 = arith.addf %359, %360 : vector<8x1xf32>
    %c0_92 = arith.constant 0 : index
    %c0_93 = arith.constant 0 : index
    %362 = vector.load %arg4[%c0_92, %c0_93] : memref<8x1xf32, #tpu.memory_space<vmem>>, vector<8x1xf32>
    tpu.vector_store %arg4[%c0_92, %c0_93], %361 {strides = array<i32>} : memref<8x1xf32, #tpu.memory_space<vmem>>, vector<8x1xf32>,
    return
  }
}

</mosaic_0001>

<bundles_post_ra>
// kernel: _lambda_.1
= control target key start
LH: loop header
LB: loop body
LE: loop exit
PB: predicated region body
PF: predicated region fallthrough
CT: control target
= control target key end

     0   :  { %vm78_vm0 = vcmask 1041408   ;;  %vm65_vm1 = vcmask 31744   ;;  %vm155_vm2 = vcmask 523264   ;;  %v1458_v21 = vmov 0.0   ;;  %s1461_s19 = smov 96   ;;  %s1800_s1 = inlined_call_operand.vmem [shape: bf16[4,128], index: 1, kind: input, shape index: {}]   ;;  %s1801_s0 = inlined_call_operand.vmem [shape: bf16[64,4], index: 0, kind: input, shape index: {}]   ;;  %s1802_s3 = inlined_call_operand.vmem [shape: f32[56,128], index: 3, kind: input, shape index: {}]   ;;  %s1803_s2 = inlined_call_operand.vmem [shape: bf16[64,256], index: 2, kind: input, shape index: {}]   ;;  %s1804_s4 = inlined_call_operand.vmem [shape: f32[8,1], index: 4, kind: output, shape index: {}]  }
   0x1   :  { %v40_v0 = vld [vmem:[%s1800_s1] sm:$0x3]  ;;  %v1314_v3 = vld [vmem:[%s1801_s0 + $0x8] sm:$0xff]   ;;  %s1457_s1 = smov 32   ;;  %156 = vst.msk [vmem:[#allocation2] sm:$0xff] %vm155_vm2, %v1458_v21  ;;  %v1459_v29 = vmov 0  }
   0x2   :  { %1305 = vmatprep.subr.msk.bf16.mxu0 %vm78_vm0, %v40_v0  ;;  %v80_v1 = vsel %vm78_vm0, %v40_v0, 0  ;;  %v1313_v2 = vld [vmem:[%s1801_s0] sm:$0xff]   ;;  %v1533_v23 = vld [vmem:[%s1803_s2 + $0x14] ss:$8 sps:$4 sm:$0xff]   ;;  %v1538_v24 = vld [vmem:[%s1803_s2 + $0x10] ss:$8 sps:$4 sm:$0xff]   ;;  %265 = vmatprep.mubr.bf16.mxu1 %v1459_v29 }
   0x3   :  { %1269 = vmatpush3.bf16.msra.mxu0 %v80_v1  ;;  %1270 = vmatprep.mubr.msk.bf16.mxu0 %vm65_vm1, %v1313_v2  ;;  %v1503_v4 = vld [vmem:[%s1802_s3] ss:$0 sm:$0xff]  ;;  %v1520_v20 = vld [vmem:[%s1803_s2 + $0x4] ss:$8 sps:$4 sm:$0xff]   ;;  %v1561_v28 = vld [vmem:[%s1803_s2 + $0x34] ss:$8 sps:$4 sm:$0xff]  }
   0x4   :  { %v1527_v22 = vld [vmem:[%s1803_s2] ss:$8 sps:$4 sm:$0xff]   ;;  %233 = vmatprep.subr.bf16.mxu1 %v1520_v20  ;;  %340 = vmatprep.subr.bf16.mxu0 %v1520_v20  ;;  %v1551_v26 = vld [vmem:[%s1803_s2 + $0x24] ss:$8 sps:$4 sm:$0xff]   ;;  %v1569_v30 = vld [vmem:[%s1803_s2 + $0x30] ss:$8 sps:$4 sm:$0xff]  }
   0x5   :  { %234 = vmatpush1.bf16.msra.mxu1 %v1527_v22  ;;  %v1556_v27 = vld [vmem:[%s1803_s2 + $0x20] ss:$8 sps:$4 sm:$0xff]   ;;  %s1460_s2 = smov 64   ;;  %vm186_vm3 = vcmask 261120   ;;  %v1327_v2 = vld [vmem:[%s1801_s0 + $0x10] sm:$0xff]   ;;  %vm303_vm4 = vcmask 523520  }
   0x6   :  { %1271 = vmatmul.mubr.msk.bf16.vlgmr.msra.gmra.mrb[0].mxu0 %vm65_vm1, %v1314_v3  ;;  %235 = vmatprep.subr.bf16.mxu1 %v1533_v23  ;;  %v1596_v37 = vld [vmem:[%s1802_s3 + $0x1] ss:$0 sm:$0xff]  ;;  %v1328_v3 = vld [vmem:[%s1801_s0 + $0x18] sm:$0xff]   ;;  %vm1463_vm5 = vmmov 0   ;;  %vm1129_vm6 = vcmask 130048   ;;  %vm1203_vm7 = vcmask 7168  }
   0x7   :  { %341 = vmatpush1.bf16.msra.mxu0 %v1527_v22  ;;  %1274 = vmatprep.mubr.msk.bf16.mxu0 %vm65_vm1, %v1327_v2 }
   0x8   :  { %342 = vmatprep.subr.bf16.mxu0 %v1533_v23 }
   0x9   :  { %236 = vmatpush1.bf16.msra.mxu1 %v1538_v24 }
   0xa   :  { %237 = vmatprep.subr.bf16.mxu1 %v1551_v26 }
   0xb   :  { %343 = vmatpush1.bf16.msra.mxu0 %v1538_v24 }
   0xc   :  { %344 = vmatprep.subr.bf16.mxu0 %v1551_v26 }
   0xd   :  { %238 = vmatpush1.bf16.msra.mxu1 %v1556_v27 }
   0xe   :  { %239 = vmatprep.subr.bf16.mxu1 %v1561_v28  ;;  %1275 = vmatmul.mubr.msk.bf16.gmra.mrb[4].mxu0 %vm65_vm1, %v1328_v3 }
   0xf   :  { %345 = vmatpush1.bf16.msra.mxu0 %v1556_v27  ;;  %372 = vmatprep.mubr.bf16.mxu0 %v1459_v29 }
  0x10   :  { %346 = vmatprep.subr.bf16.mxu0 %v1561_v28 }
  0x11   :  { %240 = vmatpush1.bf16.msra.mxu1 %v1569_v30 }
  0x12   :  { %446 = vmatprep.subr.bf16.mxu1 %v1520_v20 }
  0x13   :  { %347 = vmatpush1.bf16.msra.mxu0 %v1569_v30 }
  0x14   :  { %552 = vmatprep.subr.bf16.mxu0 %v1520_v20 }
  0xd9   :  { %v1505_v5 = vpop.f32.mrb[0].mxu0 }
  0xda   :  { %v116_v6 = vpop.f32.mrb[1].mxu0 }
  0xdb   :  { %v117_v7 = vadd.f32 %v1503_v4, %v116_v6  ;;  %v1508_v8 = vpop.f32.mrb[2].mxu0 }
  0xdc   :  { %v1510_v9 = vpop.f32.mrb[3].mxu0  ;;  %v128_v2 = vadd.f32 %v1508_v8, %v1503_v4 }
  0xdd   :  { %1329 = vtanh.f32 %v117_v7  ;;  %v1219_v11 = vmul.f32 -1.442695, %v117_v7  ;;  %v120_v36 = vadd.f32 %v1503_v4, %v1510_v9 }
  0xdf   :  { %1331 = vpow2.f32 %v1219_v11 }
  0xe7   :  { %v1330_v10 = vpop.eup %1329 }
  0xe8   :  { %167 = vrot.lane.b32.xlu0 %v1330_v10, %s1457_s1 }
  0xe9   :  { %v1332_v12 = vpop.eup %1331 }
  0xea   :  { %v161_v13 = vadd.f32 1.0, %v1332_v12 }
  0xec   :  { %1333 = vrcp.f32 %v161_v13 }
  0xf6   :  { %v1334_v14 = vpop.eup %1333 }
  0xf7   :  { %v165_v17 = vmul.f32 0.0, %v1334_v14 }
 0x15a   :  { %v168_v15 = vpop.permute.xlu0 %167 }
 0x15b   :  { %v170_v16 = vmul.f32 %v1334_v14, %v168_v15  ;;  %v1635_v15 = vpop.f32.mrb[4].mxu0 }
 0x15d   :  { %172 = vrot.lane.b32.xlu0 %v170_v16, %s1457_s1  ;;  %v1637_v16 = vpop.f32.mrb[5].mxu0 }
 0x1cf   :  { %v173_v18 = vpop.permute.xlu0 %172 }
 0x1d0   :  { %v1514_v19 = vadd.f32 %v173_v18, %v165_v17  ;;  %v1639_v17 = vpop.f32.mrb[6].mxu0 }
 0x1d1   :  { %v1641_v18 = vpop.f32.mrb[7].mxu0 }
 0x1d2   :  { %1335 = vtanh.f32 %v1514_v19 }
 0x1dc   :  { %v1336_v25 = vpop.eup %1335 }
 0x1dd   :  { %178 = vrot.lane.b32.xlu1 %v1336_v25, %s1457_s1 }
 0x24f   :  { %v179_v31 = vpop.permute.xlu1 %178 }
 0x250   :  { %v181_v32 = vmul.f32 %v1334_v14, %v179_v31 }
 0x252   :  { %183 = vrot.lane.b32.xlu1 %v181_v32, %s1460_s2 }
 0x2c4   :  { %v184_v33 = vpop.permute.xlu1 %183 }
 0x2c5   :  { %187 = vst.msk [vmem:[#allocation2] sm:$0xff] %vm186_vm3, %v184_v33 }
 0x2cc   :  { %v188_v34 = vld [vmem:[#allocation2] sm:$0xff] }
 0x2cd   :  { %v189_v35 = vpack.c.bf16 %v188_v34, %v188_v34 }
 0x2cf   :  { %1228 = vmatmul.mubr.msk.bf16.vlgmr.msra.gmra.mrb[0].mxu1 %vm155_vm2, %v189_v35 }
 0x2d0   :  { %447 = vmatpush1.bf16.msra.mxu1 %v1527_v22  ;;  %478 = vmatprep.mubr.bf16.mxu1 %v1459_v29 }
 0x2d1   :  { %448 = vmatprep.subr.bf16.mxu1 %v1533_v23 }
 0x2d4   :  { %449 = vmatpush1.bf16.msra.mxu1 %v1538_v24 }
 0x2d5   :  { %450 = vmatprep.subr.bf16.mxu1 %v1551_v26 }
 0x2d8   :  { %451 = vmatpush1.bf16.msra.mxu1 %v1556_v27 }
 0x2d9   :  { %452 = vmatprep.subr.bf16.mxu1 %v1561_v28 }
 0x2dc   :  { %453 = vmatpush1.bf16.msra.mxu1 %v1569_v30 }
 0x2dd   :  { %658 = vmatprep.subr.bf16.mxu1 %v1520_v20 }
 0x3a2   :  { %v267_v38 = vpop.f32.mrb[0].mxu1 }
 0x3a3   :  { %v305_v39 = vadd.f32 %v267_v38, %v120_v36  ;;  %v269_v40 = vpop.f32.mrb[1].mxu1 }
 0x3a4   :  { %v274_v41 = vadd.f32 %v1596_v37, %v269_v40  ;;  %v271_v42 = vpop.f32.mrb[2].mxu1 }
 0x3a5   :  { %1337 = vtanh.f32 %v305_v39  ;;  %v272_v43 = vpop.f32.mrb[3].mxu1  ;;  %v1230_v46 = vmul.f32 -1.442695, %v305_v39 }
 0x3a6   :  { %1339 = vtanh.f32 %v274_v41  ;;  %v1229_v47 = vmul.f32 -1.442695, %v274_v41 }
 0x3a7   :  { %1341 = vpow2.f32 %v1230_v46 }
 0x3a8   :  { %1343 = vpow2.f32 %v1229_v47 }
 0x3af   :  { %v1338_v44 = vpop.eup %1337 }
 0x3b0   :  { %v1340_v45 = vpop.eup %1339  ;;  %315 = vrot.lane.b32.xlu1 %v1338_v44, %s1457_s1 }
 0x3b1   :  { %284 = vrot.lane.b32.xlu0 %v1340_v45, %s1457_s1  ;;  %v1342_v48 = vpop.eup %1341 }
 0x3b2   :  { %v1344_v49 = vpop.eup %1343  ;;  %v309_v50 = vadd.f32 1.0, %v1342_v48 }
 0x3b3   :  { %v278_v51 = vadd.f32 1.0, %v1344_v49 }
 0x3b4   :  { %1345 = vrcp.f32 %v309_v50 }
 0x3b5   :  { %1347 = vrcp.f32 %v278_v51 }
 0x3be   :  { %v1346_v52 = vpop.eup %1345 }
 0x3bf   :  { %v1348_v54 = vpop.eup %1347  ;;  %v313_v58 = vmul.f32 %v1346_v52, %v1514_v19  ;;  %v125_v19 = vadd.f32 %v1505_v5, %v1503_v4 }
 0x3c0   :  { %v282_v60 = vmul.f32 0.0, %v1348_v54 }
 0x422   :  { %v316_v53 = vpop.permute.xlu1 %315 }
 0x423   :  { %v318_v55 = vmul.f32 %v1346_v52, %v316_v53  ;;  %v285_v56 = vpop.permute.xlu0 %284 }
 0x424   :  { %v287_v57 = vmul.f32 %v1348_v54, %v285_v56 }
 0x425   :  { %320 = vrot.lane.b32.xlu1 %v318_v55, %s1457_s1 }
 0x426   :  { %289 = vrot.lane.b32.xlu0 %v287_v57, %s1457_s1 }
 0x497   :  { %v321_v59 = vpop.permute.xlu1 %320 }
 0x498   :  { %v1604_v61 = vadd.f32 %v321_v59, %v313_v58  ;;  %v290_v62 = vpop.permute.xlu0 %289 }
 0x499   :  { %v1606_v63 = vadd.f32 %v290_v62, %v282_v60 }
 0x49a   :  { %1349 = vtanh.f32 %v1604_v61 }
 0x49b   :  { %1351 = vtanh.f32 %v1606_v63 }
 0x4a4   :  { %v1350_v0 = vpop.eup %1349 }
 0x4a5   :  { %v1352_v1 = vpop.eup %1351  ;;  %326 = vrot.lane.b32.xlu1 %v1350_v0, %s1457_s1 }
 0x4a6   :  { %295 = vrot.lane.b32.xlu0 %v1352_v1, %s1457_s1 }
 0x517   :  { %v327_v6 = vpop.permute.xlu1 %326 }
 0x518   :  { %v329_v7 = vmul.f32 %v1346_v52, %v327_v6  ;;  %v296_v9 = vpop.permute.xlu0 %295 }
 0x519   :  { %v298_v10 = vmul.f32 %v1348_v54, %v296_v9 }
 0x51a   :  { %331 = vrot.lane.b32.xlu1 %v329_v7, %s1460_s2 }
 0x51b   :  { %300 = vrot.lane.b32.xlu0 %v298_v10, %s1461_s19 }
 0x58c   :  { %v332_v12 = vpop.permute.xlu1 %331 }
 0x58d   :  { %v301_v11 = vpop.permute.xlu0 %300 }
 0x58e   :  { %304 = vst.msk [vmem:[#allocation2] sm:$0xff] %vm303_vm4, %v301_v11 }
 0x58f   :  { %334 = vst.msk [vmem:[#allocation2] sm:$0xff] %vm186_vm3, %v332_v12 }
 0x596   :  { %v335_v13 = vld [vmem:[#allocation2] sm:$0xff] }
 0x597   :  { %v336_v14 = vpack.c.bf16 %v335_v13, %v335_v13 }
 0x599   :  { %1231 = vmatmul.mubr.msk.bf16.vlgmr.msra.gmra.mrb[8].mxu0 %vm155_vm2, %v336_v14 }
 0x59a   :  { %553 = vmatpush1.bf16.msra.mxu0 %v1527_v22  ;;  %584 = vmatprep.mubr.bf16.mxu0 %v1459_v29 }
 0x59b   :  { %554 = vmatprep.subr.bf16.mxu0 %v1533_v23 }
 0x59e   :  { %555 = vmatpush1.bf16.msra.mxu0 %v1538_v24 }
 0x59f   :  { %556 = vmatprep.subr.bf16.mxu0 %v1551_v26 }
 0x5a2   :  { %557 = vmatpush1.bf16.msra.mxu0 %v1556_v27 }
 0x5a3   :  { %558 = vmatprep.subr.bf16.mxu0 %v1561_v28 }
 0x5a6   :  { %559 = vmatpush1.bf16.msra.mxu0 %v1569_v30 }
 0x5a7   :  { %764 = vmatprep.subr.bf16.mxu0 %v1520_v20 }
 0x66c   :  { %v374_v25 = vpop.f32.mrb[8].mxu0 }
 0x66d   :  { %v411_v31 = vadd.f32 %v374_v25, %v125_v19  ;;  %v376_v32 = vpop.f32.mrb[9].mxu0 }
 0x66e   :  { %v381_v33 = vadd.f32 %v1596_v37, %v376_v32  ;;  %v378_v34 = vpop.f32.mrb[10].mxu0 }
 0x66f   :  { %1353 = vtanh.f32 %v411_v31  ;;  %v379_v35 = vpop.f32.mrb[11].mxu0  ;;  %v1233_v39 = vmul.f32 -1.442695, %v411_v31 }
 0x670   :  { %1355 = vtanh.f32 %v381_v33  ;;  %v1232_v40 = vmul.f32 -1.442695, %v381_v33 }
 0x671   :  { %1357 = vpow2.f32 %v1233_v39 }
 0x672   :  { %1359 = vpow2.f32 %v1232_v40 }
 0x679   :  { %v1354_v36 = vpop.eup %1353 }
 0x67a   :  { %v1356_v38 = vpop.eup %1355  ;;  %421 = vrot.lane.b32.xlu1 %v1354_v36, %s1457_s1 }
 0x67b   :  { %391 = vrot.lane.b32.xlu0 %v1356_v38, %s1457_s1  ;;  %v1358_v5 = vpop.eup %1357 }
 0x67c   :  { %v1360_v41 = vpop.eup %1359  ;;  %v415_v42 = vadd.f32 1.0, %v1358_v5 }
 0x67d   :  { %v385_v43 = vadd.f32 1.0, %v1360_v41 }
 0x67e   :  { %1361 = vrcp.f32 %v415_v42 }
 0x67f   :  { %1363 = vrcp.f32 %v385_v43 }
 0x688   :  { %v1362_v44 = vpop.eup %1361 }
 0x689   :  { %v1364_v46 = vpop.eup %1363  ;;  %v419_v50 = vmul.f32 %v1362_v44, %v1604_v61 }
 0x68a   :  { %v389_v52 = vmul.f32 %v1364_v46, %v1606_v63 }
 0x6ec   :  { %v422_v45 = vpop.permute.xlu1 %421 }
 0x6ed   :  { %v424_v47 = vmul.f32 %v1362_v44, %v422_v45  ;;  %v392_v48 = vpop.permute.xlu0 %391 }
 0x6ee   :  { %v394_v49 = vmul.f32 %v1364_v46, %v392_v48 }
 0x6ef   :  { %426 = vrot.lane.b32.xlu1 %v424_v47, %s1457_s1 }
 0x6f0   :  { %396 = vrot.lane.b32.xlu0 %v394_v49, %s1457_s1 }
 0x761   :  { %v427_v51 = vpop.permute.xlu1 %426 }
 0x762   :  { %v429_v53 = vadd.f32 %v427_v51, %v419_v50  ;;  %v397_v54 = vpop.permute.xlu0 %396 }
 0x763   :  { %v399_v55 = vadd.f32 %v397_v54, %v389_v52 }
 0x764   :  { %1365 = vtanh.f32 %v429_v53 }
 0x765   :  { %1367 = vtanh.f32 %v399_v55 }
 0x76e   :  { %v1366_v56 = vpop.eup %1365 }
 0x76f   :  { %v1368_v57 = vpop.eup %1367  ;;  %432 = vrot.lane.b32.xlu1 %v1366_v56, %s1457_s1 }
 0x770   :  { %402 = vrot.lane.b32.xlu0 %v1368_v57, %s1457_s1 }
 0x7e1   :  { %v433_v58 = vpop.permute.xlu1 %432 }
 0x7e2   :  { %v435_v59 = vmul.f32 %v1362_v44, %v433_v58  ;;  %v403_v60 = vpop.permute.xlu0 %402 }
 0x7e3   :  { %v405_v62 = vmul.f32 %v1364_v46, %v403_v60 }
 0x7e4   :  { %437 = vrot.lane.b32.xlu1 %v435_v59, %s1460_s2 }
 0x7e5   :  { %407 = vrot.lane.b32.xlu0 %v405_v62, %s1461_s19 }
 0x856   :  { %v438_v63 = vpop.permute.xlu1 %437 }
 0x857   :  { %v408_v61 = vpop.permute.xlu0 %407 }
 0x858   :  { %410 = vst.msk [vmem:[#allocation2] sm:$0xff] %vm303_vm4, %v408_v61 }
 0x859   :  { %440 = vst.msk [vmem:[#allocation2] sm:$0xff] %vm186_vm3, %v438_v63 }
 0x860   :  { %v441_v0 = vld [vmem:[#allocation2] sm:$0xff] }
 0x861   :  { %v442_v1 = vpack.c.bf16 %v441_v0, %v441_v0 }
 0x863   :  { %1234 = vmatmul.mubr.msk.bf16.vlgmr.msra.gmra.mrb[4].mxu1 %vm155_vm2, %v442_v1 }
 0x864   :  { %659 = vmatpush1.bf16.msra.mxu1 %v1527_v22  ;;  %690 = vmatprep.mubr.bf16.mxu1 %v1459_v29 }
 0x865   :  { %660 = vmatprep.subr.bf16.mxu1 %v1533_v23 }
 0x868   :  { %661 = vmatpush1.bf16.msra.mxu1 %v1538_v24 }
 0x869   :  { %662 = vmatprep.subr.bf16.mxu1 %v1551_v26 }
 0x86c   :  { %663 = vmatpush1.bf16.msra.mxu1 %v1556_v27 }
 0x86d   :  { %664 = vmatprep.subr.bf16.mxu1 %v1561_v28 }
 0x870   :  { %665 = vmatpush1.bf16.msra.mxu1 %v1569_v30 }
 0x871   :  { %870 = vmatprep.subr.bf16.mxu1 %v1520_v20 }
 0x936   :  { %v480_v3 = vpop.f32.mrb[4].mxu1 }
 0x937   :  { %v517_v6 = vadd.f32 %v480_v3, %v128_v2  ;;  %v482_v7 = vpop.f32.mrb[5].mxu1 }
 0x938   :  { %v487_v9 = vadd.f32 %v1596_v37, %v482_v7  ;;  %v484_v10 = vpop.f32.mrb[6].mxu1 }
 0x939   :  { %1369 = vtanh.f32 %v517_v6  ;;  %v485_v11 = vpop.f32.mrb[7].mxu1  ;;  %v1236_v14 = vmul.f32 -1.442695, %v517_v6 }
 0x93a   :  { %1371 = vtanh.f32 %v487_v9  ;;  %v1235_v19 = vmul.f32 -1.442695, %v487_v9 }
 0x93b   :  { %1373 = vpow2.f32 %v1236_v14 }
 0x93c   :  { %1375 = vpow2.f32 %v1235_v19 }
 0x943   :  { %v1370_v12 = vpop.eup %1369 }
 0x944   :  { %v1372_v13 = vpop.eup %1371  ;;  %527 = vrot.lane.b32.xlu1 %v1370_v12, %s1457_s1 }
 0x945   :  { %497 = vrot.lane.b32.xlu0 %v1372_v13, %s1457_s1  ;;  %v1374_v8 = vpop.eup %1373 }
 0x946   :  { %v1376_v25 = vpop.eup %1375  ;;  %v521_v31 = vadd.f32 1.0, %v1374_v8 }
 0x947   :  { %v491_v32 = vadd.f32 1.0, %v1376_v25 }
 0x948   :  { %1377 = vrcp.f32 %v521_v31 }
 0x949   :  { %1379 = vrcp.f32 %v491_v32 }
 0x952   :  { %v1378_v33 = vpop.eup %1377 }
 0x953   :  { %v1380_v35 = vpop.eup %1379  ;;  %v525_v40 = vmul.f32 %v1378_v33, %v429_v53 }
 0x954   :  { %v495_v41 = vmul.f32 %v1380_v35, %v399_v55  ;;  %v133_v55 = vadd.f32 %v1503_v4, %v1637_v16 }
 0x9b6   :  { %v528_v34 = vpop.permute.xlu1 %527 }
 0x9b7   :  { %v530_v36 = vmul.f32 %v1378_v33, %v528_v34  ;;  %v498_v38 = vpop.permute.xlu0 %497 }
 0x9b8   :  { %v500_v39 = vmul.f32 %v1380_v35, %v498_v38 }
 0x9b9   :  { %532 = vrot.lane.b32.xlu1 %v530_v36, %s1457_s1 }
 0x9ba   :  { %502 = vrot.lane.b32.xlu0 %v500_v39, %s1457_s1 }
 0xa2b   :  { %v533_v5 = vpop.permute.xlu1 %532 }
 0xa2c   :  { %v535_v42 = vadd.f32 %v533_v5, %v525_v40  ;;  %v503_v43 = vpop.permute.xlu0 %502 }
 0xa2d   :  { %v505_v44 = vadd.f32 %v503_v43, %v495_v41 }
 0xa2e   :  { %1381 = vtanh.f32 %v535_v42 }
 0xa2f   :  { %1383 = vtanh.f32 %v505_v44 }
 0xa38   :  { %v1382_v45 = vpop.eup %1381 }
 0xa39   :  { %v1384_v46 = vpop.eup %1383  ;;  %538 = vrot.lane.b32.xlu1 %v1382_v45, %s1457_s1 }
 0xa3a   :  { %508 = vrot.lane.b32.xlu0 %v1384_v46, %s1457_s1 }
 0xaab   :  { %v539_v47 = vpop.permute.xlu1 %538 }
 0xaac   :  { %v541_v48 = vmul.f32 %v1378_v33, %v539_v47  ;;  %v509_v49 = vpop.permute.xlu0 %508 }
 0xaad   :  { %v511_v50 = vmul.f32 %v1380_v35, %v509_v49 }
 0xaae   :  { %543 = vrot.lane.b32.xlu1 %v541_v48, %s1460_s2 }
 0xaaf   :  { %513 = vrot.lane.b32.xlu0 %v511_v50, %s1461_s19 }
 0xb20   :  { %v544_v52 = vpop.permute.xlu1 %543 }
 0xb21   :  { %v514_v51 = vpop.permute.xlu0 %513 }
 0xb22   :  { %516 = vst.msk [vmem:[#allocation2] sm:$0xff] %vm303_vm4, %v514_v51 }
 0xb23   :  { %546 = vst.msk [vmem:[#allocation2] sm:$0xff] %vm186_vm3, %v544_v52 }
 0xb2a   :  { %v547_v53 = vld [vmem:[#allocation2] sm:$0xff] }
 0xb2b   :  { %v548_v54 = vpack.c.bf16 %v547_v53, %v547_v53 }
 0xb2d   :  { %1237 = vmatmul.mubr.msk.bf16.vlgmr.msra.gmra.mrb[12].mxu0 %vm155_vm2, %v548_v54 }
 0xb2e   :  { %765 = vmatpush1.bf16.msra.mxu0 %v1527_v22  ;;  %796 = vmatprep.mubr.bf16.mxu0 %v1459_v29 }
 0xb2f   :  { %766 = vmatprep.subr.bf16.mxu0 %v1533_v23 }
 0xb32   :  { %767 = vmatpush1.bf16.msra.mxu0 %v1538_v24 }
 0xb33   :  { %768 = vmatprep.subr.bf16.mxu0 %v1551_v26 }
 0xb36   :  { %769 = vmatpush1.bf16.msra.mxu0 %v1556_v27 }
 0xb37   :  { %770 = vmatprep.subr.bf16.mxu0 %v1561_v28 }
 0xb3a   :  { %771 = vmatpush1.bf16.msra.mxu0 %v1569_v30 }
 0xb3b   :  { %976 = vmatprep.subr.bf16.mxu0 %v1520_v20 }
 0xc00   :  { %v586_v56 = vpop.f32.mrb[12].mxu0 }
 0xc01   :  { %v623_v57 = vadd.f32 %v586_v56, %v133_v55  ;;  %v588_v58 = vpop.f32.mrb[13].mxu0 }
 0xc02   :  { %v593_v59 = vadd.f32 %v1596_v37, %v588_v58  ;;  %v590_v60 = vpop.f32.mrb[14].mxu0 }
 0xc03   :  { %1385 = vtanh.f32 %v623_v57  ;;  %v591_v62 = vpop.f32.mrb[15].mxu0  ;;  %v1239_v0 = vmul.f32 -1.442695, %v623_v57 }
 0xc04   :  { %1387 = vtanh.f32 %v593_v59  ;;  %v1238_v20 = vmul.f32 -1.442695, %v593_v59 }
 0xc05   :  { %1389 = vpow2.f32 %v1239_v0 }
 0xc06   :  { %1391 = vpow2.f32 %v1238_v20 }
 0xc0d   :  { %v1386_v61 = vpop.eup %1385 }
 0xc0e   :  { %v1388_v63 = vpop.eup %1387  ;;  %633 = vrot.lane.b32.xlu1 %v1386_v61, %s1457_s1 }
 0xc0f   :  { %603 = vrot.lane.b32.xlu0 %v1388_v63, %s1457_s1  ;;  %v1390_v16 = vpop.eup %1389 }
 0xc10   :  { %v1392_v1 = vpop.eup %1391  ;;  %v627_v2 = vadd.f32 1.0, %v1390_v16 }
 0xc11   :  { %v597_v3 = vadd.f32 1.0, %v1392_v1 }
 0xc12   :  { %1393 = vrcp.f32 %v627_v2 }
 0xc13   :  { %1395 = vrcp.f32 %v597_v3 }
 0xc1c   :  { %v1394_v6 = vpop.eup %1393 }
 0xc1d   :  { %v1396_v9 = vpop.eup %1395  ;;  %v631_v13 = vmul.f32 %v1394_v6, %v535_v42  ;;  %v136_v42 = vadd.f32 %v1503_v4, %v1641_v18 }
 0xc1e   :  { %v601_v19 = vmul.f32 %v1396_v9, %v505_v44 }
 0xc80   :  { %v634_v7 = vpop.permute.xlu1 %633 }
 0xc81   :  { %v636_v10 = vmul.f32 %v1394_v6, %v634_v7  ;;  %v604_v11 = vpop.permute.xlu0 %603 }
 0xc82   :  { %v606_v12 = vmul.f32 %v1396_v9, %v604_v11 }
 0xc83   :  { %638 = vrot.lane.b32.xlu1 %v636_v10, %s1457_s1 }
 0xc84   :  { %608 = vrot.lane.b32.xlu0 %v606_v12, %s1457_s1 }
 0xcf5   :  { %v639_v14 = vpop.permute.xlu1 %638 }
 0xcf6   :  { %v641_v8 = vadd.f32 %v639_v14, %v631_v13  ;;  %v609_v25 = vpop.permute.xlu0 %608 }
 0xcf7   :  { %v611_v31 = vadd.f32 %v609_v25, %v601_v19  ;;  %v141_v19 = vadd.f32 %v1635_v15, %v1503_v4 }
 0xcf8   :  { %1397 = vtanh.f32 %v641_v8 }
 0xcf9   :  { %1399 = vtanh.f32 %v611_v31 }
 0xd02   :  { %v1398_v32 = vpop.eup %1397 }
 0xd03   :  { %v1400_v33 = vpop.eup %1399  ;;  %644 = vrot.lane.b32.xlu1 %v1398_v32, %s1457_s1 }
 0xd04   :  { %614 = vrot.lane.b32.xlu0 %v1400_v33, %s1457_s1 }
 0xd75   :  { %v645_v34 = vpop.permute.xlu1 %644 }
 0xd76   :  { %v647_v35 = vmul.f32 %v1394_v6, %v645_v34  ;;  %v615_v36 = vpop.permute.xlu0 %614 }
 0xd77   :  { %v617_v38 = vmul.f32 %v1396_v9, %v615_v36 }
 0xd78   :  { %649 = vrot.lane.b32.xlu1 %v647_v35, %s1460_s2 }
 0xd79   :  { %619 = vrot.lane.b32.xlu0 %v617_v38, %s1461_s19 }
 0xdea   :  { %v650_v40 = vpop.permute.xlu1 %649 }
 0xdeb   :  { %v620_v39 = vpop.permute.xlu0 %619 }
 0xdec   :  { %622 = vst.msk [vmem:[#allocation2] sm:$0xff] %vm303_vm4, %v620_v39 }
 0xded   :  { %652 = vst.msk [vmem:[#allocation2] sm:$0xff] %vm186_vm3, %v650_v40 }
 0xdf4   :  { %v653_v5 = vld [vmem:[#allocation2] sm:$0xff] }
 0xdf5   :  { %v654_v41 = vpack.c.bf16 %v653_v5, %v653_v5 }
 0xdf7   :  { %1240 = vmatmul.mubr.msk.bf16.vlgmr.msra.gmra.mrb[8].mxu1 %vm155_vm2, %v654_v41 }
 0xdf8   :  { %871 = vmatpush1.bf16.msra.mxu1 %v1527_v22  ;;  %902 = vmatprep.mubr.bf16.mxu1 %v1459_v29 }
 0xdf9   :  { %872 = vmatprep.subr.bf16.mxu1 %v1533_v23 }
 0xdfc   :  { %873 = vmatpush1.bf16.msra.mxu1 %v1538_v24 }
 0xdfd   :  { %874 = vmatprep.subr.bf16.mxu1 %v1551_v26 }
 0xe00   :  { %875 = vmatpush1.bf16.msra.mxu1 %v1556_v27 }
 0xe01   :  { %876 = vmatprep.subr.bf16.mxu1 %v1561_v28 }
 0xe04   :  { %877 = vmatpush1.bf16.msra.mxu1 %v1569_v30 }
 0xeca   :  { %v692_v43 = vpop.f32.mrb[8].mxu1 }
 0xecb   :  { %v729_v44 = vadd.f32 %v692_v43, %v136_v42  ;;  %v694_v45 = vpop.f32.mrb[9].mxu1 }
 0xecc   :  { %v699_v46 = vadd.f32 %v1596_v37, %v694_v45  ;;  %v696_v47 = vpop.f32.mrb[10].mxu1 }
 0xecd   :  { %1401 = vtanh.f32 %v729_v44  ;;  %v697_v48 = vpop.f32.mrb[11].mxu1  ;;  %v1242_v51 = vmul.f32 -1.442695, %v729_v44 }
 0xece   :  { %1403 = vtanh.f32 %v699_v46  ;;  %v1241_v52 = vmul.f32 -1.442695, %v699_v46 }
 0xecf   :  { %1405 = vpow2.f32 %v1242_v51 }
 0xed0   :  { %1407 = vpow2.f32 %v1241_v52 }
 0xed7   :  { %v1402_v49 = vpop.eup %1401 }
 0xed8   :  { %v1404_v50 = vpop.eup %1403  ;;  %739 = vrot.lane.b32.xlu1 %v1402_v49, %s1457_s1 }
 0xed9   :  { %709 = vrot.lane.b32.xlu0 %v1404_v50, %s1457_s1  ;;  %v1406_v18 = vpop.eup %1405 }
 0xeda   :  { %v1408_v53 = vpop.eup %1407  ;;  %v733_v54 = vadd.f32 1.0, %v1406_v18 }
 0xedb   :  { %v703_v55 = vadd.f32 1.0, %v1408_v53 }
 0xedc   :  { %1409 = vrcp.f32 %v733_v54 }
 0xedd   :  { %1411 = vrcp.f32 %v703_v55  ;;  %v144_v55 = vadd.f32 %v1639_v17, %v1503_v4 }
 0xee6   :  { %v1410_v56 = vpop.eup %1409 }
 0xee7   :  { %v1412_v58 = vpop.eup %1411  ;;  %v737_v61 = vmul.f32 %v1410_v56, %v641_v8 }
 0xee8   :  { %v707_v0 = vmul.f32 %v1412_v58, %v611_v31 }
 0xf4a   :  { %v740_v57 = vpop.permute.xlu1 %739 }
 0xf4b   :  { %v742_v59 = vmul.f32 %v1410_v56, %v740_v57  ;;  %v710_v60 = vpop.permute.xlu0 %709 }
 0xf4c   :  { %v712_v62 = vmul.f32 %v1412_v58, %v710_v60 }
 0xf4d   :  { %744 = vrot.lane.b32.xlu1 %v742_v59, %s1457_s1 }
 0xf4e   :  { %714 = vrot.lane.b32.xlu0 %v712_v62, %s1457_s1 }
 0xfbf   :  { %v745_v63 = vpop.permute.xlu1 %744 }
 0xfc0   :  { %v747_v20 = vadd.f32 %v745_v63, %v737_v61  ;;  %v715_v16 = vpop.permute.xlu0 %714 }
 0xfc1   :  { %v717_v1 = vadd.f32 %v715_v16, %v707_v0 }
 0xfc2   :  { %1413 = vtanh.f32 %v747_v20 }
 0xfc3   :  { %1415 = vtanh.f32 %v717_v1 }
 0xfcc   :  { %v1414_v2 = vpop.eup %1413 }
 0xfcd   :  { %v1416_v3 = vpop.eup %1415  ;;  %750 = vrot.lane.b32.xlu1 %v1414_v2, %s1457_s1 }
 0xfce   :  { %720 = vrot.lane.b32.xlu0 %v1416_v3, %s1457_s1 }
0x103f   :  { %v751_v6 = vpop.permute.xlu1 %750 }
0x1040   :  { %v753_v7 = vmul.f32 %v1410_v56, %v751_v6  ;;  %v721_v9 = vpop.permute.xlu0 %720 }
0x1041   :  { %v723_v10 = vmul.f32 %v1412_v58, %v721_v9 }
0x1042   :  { %755 = vrot.lane.b32.xlu1 %v753_v7, %s1460_s2 }
0x1043   :  { %725 = vrot.lane.b32.xlu0 %v723_v10, %s1461_s19 }
0x10b4   :  { %v756_v12 = vpop.permute.xlu1 %755 }
0x10b5   :  { %v726_v11 = vpop.permute.xlu0 %725 }
0x10b6   :  { %728 = vst.msk [vmem:[#allocation2] sm:$0xff] %vm303_vm4, %v726_v11 }
0x10b7   :  { %758 = vst.msk [vmem:[#allocation2] sm:$0xff] %vm186_vm3, %v756_v12 }
0x10be   :  { %v759_v13 = vld [vmem:[#allocation2] sm:$0xff] }
0x10bf   :  { %v760_v14 = vpack.c.bf16 %v759_v13, %v759_v13 }
0x10c1   :  { %1243 = vmatmul.mubr.msk.bf16.vlgmr.msra.gmra.mrb[16].mxu0 %vm155_vm2, %v760_v14 }
0x10c2   :  { %977 = vmatpush1.bf16.msra.mxu0 %v1527_v22  ;;  %1008 = vmatprep.mubr.bf16.mxu0 %v1459_v29 }
0x10c3   :  { %978 = vmatprep.subr.bf16.mxu0 %v1533_v23 }
0x10c6   :  { %979 = vmatpush1.bf16.msra.mxu0 %v1538_v24 }
0x10c7   :  { %980 = vmatprep.subr.bf16.mxu0 %v1551_v26 }
0x10ca   :  { %981 = vmatpush1.bf16.msra.mxu0 %v1556_v27 }
0x10cb   :  { %982 = vmatprep.subr.bf16.mxu0 %v1561_v28 }
0x10ce   :  { %983 = vmatpush1.bf16.msra.mxu0 %v1569_v30 }
0x1194   :  { %v798_v8 = vpop.f32.mrb[16].mxu0 }
0x1195   :  { %v835_v25 = vadd.f32 %v798_v8, %v141_v19  ;;  %v800_v22 = vpop.f32.mrb[17].mxu0 }
0x1196   :  { %v805_v29 = vadd.f32 %v1596_v37, %v800_v22  ;;  %v802_v31 = vpop.f32.mrb[18].mxu0 }
0x1197   :  { %1417 = vtanh.f32 %v835_v25  ;;  %v803_v23 = vpop.f32.mrb[19].mxu0  ;;  %v1245_v27 = vmul.f32 -1.442695, %v835_v25 }
0x1198   :  { %1419 = vtanh.f32 %v805_v29  ;;  %v1244_v28 = vmul.f32 -1.442695, %v805_v29 }
0x1199   :  { %1421 = vpow2.f32 %v1245_v27 }
0x119a   :  { %1423 = vpow2.f32 %v1244_v28 }
0x11a1   :  { %v1418_v24 = vpop.eup %1417 }
0x11a2   :  { %v1420_v26 = vpop.eup %1419  ;;  %845 = vrot.lane.b32.xlu1 %v1418_v24, %s1457_s1 }
0x11a3   :  { %815 = vrot.lane.b32.xlu0 %v1420_v26, %s1457_s1  ;;  %v1422_v30 = vpop.eup %1421 }
0x11a4   :  { %v1424_v15 = vpop.eup %1423  ;;  %v839_v32 = vadd.f32 1.0, %v1422_v30 }
0x11a5   :  { %v809_v33 = vadd.f32 1.0, %v1424_v15 }
0x11a6   :  { %1425 = vrcp.f32 %v839_v32 }
0x11a7   :  { %1427 = vrcp.f32 %v809_v33 }
0x11b0   :  { %v1426_v34 = vpop.eup %1425 }
0x11b1   :  { %v1428_v36 = vpop.eup %1427  ;;  %v843_v5 = vmul.f32 %v1426_v34, %v747_v20 }
0x11b2   :  { %v813_v42 = vmul.f32 %v1428_v36, %v717_v1 }
0x1214   :  { %v846_v35 = vpop.permute.xlu1 %845 }
0x1215   :  { %v848_v38 = vmul.f32 %v1426_v34, %v846_v35  ;;  %v816_v39 = vpop.permute.xlu0 %815 }
0x1216   :  { %v818_v40 = vmul.f32 %v1428_v36, %v816_v39 }
0x1217   :  { %850 = vrot.lane.b32.xlu1 %v848_v38, %s1457_s1 }
0x1218   :  { %820 = vrot.lane.b32.xlu0 %v818_v40, %s1457_s1 }
0x1289   :  { %v851_v41 = vpop.permute.xlu1 %850 }
0x128a   :  { %v853_v43 = vadd.f32 %v851_v41, %v843_v5  ;;  %v821_v44 = vpop.permute.xlu0 %820 }
0x128b   :  { %v823_v45 = vadd.f32 %v821_v44, %v813_v42 }
0x128c   :  { %1429 = vtanh.f32 %v853_v43 }
0x128d   :  { %1431 = vtanh.f32 %v823_v45 }
0x1296   :  { %v1430_v46 = vpop.eup %1429 }
0x1297   :  { %v1432_v47 = vpop.eup %1431  ;;  %856 = vrot.lane.b32.xlu1 %v1430_v46, %s1457_s1  ;;  %v27_v46 = vld [vmem:[%s1802_s3 + $0x10] sm:$0xff] }
0x1298   :  { %826 = vrot.lane.b32.xlu0 %v1432_v47, %s1457_s1  ;;  %v28_v47 = vld [vmem:[%s1802_s3 + $0x18] sm:$0xff] }
0x1309   :  { %v857_v48 = vpop.permute.xlu1 %856 }
0x130a   :  { %v859_v49 = vmul.f32 %v1426_v34, %v857_v48  ;;  %v827_v50 = vpop.permute.xlu0 %826  ;;  %v1462_v48 = vmov 0.0|0.0  }
0x130b   :  { %v829_v51 = vmul.f32 %v1428_v36, %v827_v50  ;;  %1296 = vmatprep.subr.bf16.mxu1 %v1462_v48  ;;  %v29_v50 = vld [vmem:[%s1802_s3 + $0x20] sm:$0xff]  ;;  %1302 = vmatprep.subr.bf16.mxu0 %v1462_v48 }
0x130c   :  { %861 = vrot.lane.b32.xlu1 %v859_v49, %s1460_s2 }
0x130d   :  { %831 = vrot.lane.b32.xlu0 %v829_v51, %s1461_s19  ;;  %v1300_v51 = vpack.c.bf16 %v29_v50, %v28_v47 }
0x137e   :  { %v862_v18 = vpop.permute.xlu1 %861 }
0x137f   :  { %v832_v52 = vpop.permute.xlu0 %831 }
0x1380   :  { %834 = vst.msk [vmem:[#allocation2] sm:$0xff] %vm303_vm4, %v832_v52 }
0x1381   :  { %864 = vst.msk [vmem:[#allocation2] sm:$0xff] %vm186_vm3, %v862_v18  ;;  %v30_v18 = vld [vmem:[%s1802_s3 + $0x28] sm:$0xff] }
0x1388   :  { %v865_v53 = vld [vmem:[#allocation2] sm:$0xff] }
0x1389   :  { %v866_v54 = vpack.c.bf16 %v865_v53, %v865_v53  ;;  %v31_v53 = vld [vmem:[%s1802_s3 + $0x30] sm:$0xff] }
0x138b   :  { %1246 = vmatmul.mubr.msk.bf16.vlgmr.msra.gmra.mrb[12].mxu1 %vm155_vm2, %v866_v54  ;;  %v1303_v54 = vpack.c.bf16 %v31_v53, %v30_v18 }
0x138c   :  { %1286 = vmatprep.mubr.msk.f32.mxu1 %vm1463_vm5, %v1458_v21 }
0x145e   :  { %v904_v56 = vpop.f32.mrb[12].mxu1 }
0x145f   :  { %v941_v57 = vadd.f32 %v904_v56, %v144_v55  ;;  %v906_v58 = vpop.f32.mrb[13].mxu1 }
0x1460   :  { %v911_v59 = vadd.f32 %v1596_v37, %v906_v58  ;;  %v908_v60 = vpop.f32.mrb[14].mxu1  ;;  %v1251_v58 = vld [vmem:[%s1802_s3 + $0x2] ss:$0 sm:$0xff] }
0x1461   :  { %1433 = vtanh.f32 %v941_v57  ;;  %v909_v62 = vpop.f32.mrb[15].mxu1  ;;  %v1248_v0 = vmul.f32 -1.442695, %v941_v57 }
0x1462   :  { %1435 = vtanh.f32 %v911_v59  ;;  %v1247_v20 = vmul.f32 -1.442695, %v911_v59 }
0x1463   :  { %1437 = vpow2.f32 %v1248_v0 }
0x1464   :  { %1439 = vpow2.f32 %v1247_v20 }
0x146b   :  { %v1434_v61 = vpop.eup %1433 }
0x146c   :  { %v1436_v63 = vpop.eup %1435  ;;  %951 = vrot.lane.b32.xlu1 %v1434_v61, %s1457_s1 }
0x146d   :  { %921 = vrot.lane.b32.xlu0 %v1436_v63, %s1457_s1  ;;  %v1438_v4 = vpop.eup %1437  ;;  %v1253_v63 = vld [vmem:[%s1802_s3 + $0x3] ss:$0 sm:$0xff] }
0x146e   :  { %v1440_v17 = vpop.eup %1439  ;;  %v945_v16 = vadd.f32 1.0, %v1438_v4 }
0x146f   :  { %v915_v1 = vadd.f32 1.0, %v1440_v17 }
0x1470   :  { %1441 = vrcp.f32 %v945_v16 }
0x1471   :  { %1443 = vrcp.f32 %v915_v1 }
0x147a   :  { %v1442_v2 = vpop.eup %1441 }
0x147b   :  { %v1444_v6 = vpop.eup %1443  ;;  %v949_v11 = vmul.f32 %v1442_v2, %v853_v43 }
0x147c   :  { %v919_v13 = vmul.f32 %v1444_v6, %v823_v45 }
0x14de   :  { %v952_v3 = vpop.permute.xlu1 %951 }
0x14df   :  { %v954_v7 = vmul.f32 %v1442_v2, %v952_v3  ;;  %v922_v9 = vpop.permute.xlu0 %921 }
0x14e0   :  { %v924_v10 = vmul.f32 %v1444_v6, %v922_v9 }
0x14e1   :  { %956 = vrot.lane.b32.xlu1 %v954_v7, %s1457_s1 }
0x14e2   :  { %926 = vrot.lane.b32.xlu0 %v924_v10, %s1457_s1 }
0x1553   :  { %v957_v12 = vpop.permute.xlu1 %956 }
0x1554   :  { %v959_v14 = vadd.f32 %v957_v12, %v949_v11  ;;  %v927_v19 = vpop.permute.xlu0 %926 }
0x1555   :  { %v929_v8 = vadd.f32 %v927_v19, %v919_v13 }
0x1556   :  { %1445 = vtanh.f32 %v959_v14 }
0x1557   :  { %1447 = vtanh.f32 %v929_v8 }
0x1560   :  { %v1446_v25 = vpop.eup %1445 }
0x1561   :  { %v1448_v22 = vpop.eup %1447  ;;  %962 = vrot.lane.b32.xlu1 %v1446_v25, %s1457_s1 }
0x1562   :  { %932 = vrot.lane.b32.xlu0 %v1448_v22, %s1457_s1 }
0x15d3   :  { %v963_v29 = vpop.permute.xlu1 %962 }
0x15d4   :  { %v965_v31 = vmul.f32 %v1442_v2, %v963_v29  ;;  %v933_v23 = vpop.permute.xlu0 %932 }
0x15d5   :  { %v935_v24 = vmul.f32 %v1444_v6, %v933_v23 }
0x15d6   :  { %967 = vrot.lane.b32.xlu1 %v965_v31, %s1460_s2 }
0x15d7   :  { %937 = vrot.lane.b32.xlu0 %v935_v24, %s1461_s19 }
0x1648   :  { %v968_v27 = vpop.permute.xlu1 %967 }
0x1649   :  { %v938_v26 = vpop.permute.xlu0 %937 }
0x164a   :  { %940 = vst.msk [vmem:[#allocation2] sm:$0xff] %vm303_vm4, %v938_v26 }
0x164b   :  { %970 = vst.msk [vmem:[#allocation2] sm:$0xff] %vm186_vm3, %v968_v27 }
0x1652   :  { %v971_v28 = vld [vmem:[#allocation2] sm:$0xff] }
0x1653   :  { %v972_v30 = vpack.c.bf16 %v971_v28, %v971_v28 }
0x1655   :  { %1249 = vmatmul.mubr.msk.bf16.vlgmr.msra.gmra.mrb[20].mxu0 %vm155_vm2, %v972_v30 }
0x1656   :  { %1293 = vmatprep.mubr.msk.f32.mxu0 %vm1463_vm5, %v1458_v21  ;;  %1304 = vmatpush3.bf16.msra.mxu0 %v1303_v54 }
0x1728   :  { %v1010_v15 = vpop.f32.mrb[20].mxu0 }
0x1729   :  { %v1011_v32 = vpop.f32.mrb[21].mxu0 }
0x172a   :  { %v1016_v33 = vadd.f32 %v1596_v37, %v1011_v32  ;;  %v1013_v34 = vpop.f32.mrb[22].mxu0  ;;  %v26_v37 = vld [vmem:[%s1802_s3 + $0x8] sm:$0xff] }
0x172b   :  { %v1014_v35 = vpop.f32.mrb[23].mxu0  ;;  %v1297_v49 = vpack.c.bf16 %v27_v46, %v26_v37 }
0x172c   :  { %1449 = vtanh.f32 %v1016_v33  ;;  %v1250_v38 = vmul.f32 -1.442695, %v1016_v33 }
0x172d   :  { %1298 = vmatpush3.bf16.msra.mxu1 %v1297_v49 }
0x172e   :  { %1451 = vpow2.f32 %v1250_v38  ;;  %1299 = vmatprep.subr.bf16.mxu1 %v1462_v48 }
0x1731   :  { %1301 = vmatpush3.bf16.msra.mxu1 %v1300_v51 }
0x1736   :  { %v1450_v36 = vpop.eup %1449 }
0x1737   :  { %1026 = vrot.lane.b32.xlu0 %v1450_v36, %s1457_s1 }
0x1738   :  { %v1452_v39 = vpop.eup %1451 }
0x1739   :  { %v1020_v40 = vadd.f32 1.0, %v1452_v39 }
0x173b   :  { %1453 = vrcp.f32 %v1020_v40 }
0x1745   :  { %v1454_v5 = vpop.eup %1453 }
0x1746   :  { %v1024_v43 = vmul.f32 %v1454_v5, %v929_v8 }
0x17a9   :  { %v1027_v41 = vpop.permute.xlu0 %1026 }
0x17aa   :  { %v1029_v42 = vmul.f32 %v1454_v5, %v1027_v41 }
0x17ac   :  { %1031 = vrot.lane.b32.xlu1 %v1029_v42, %s1457_s1 }
0x181e   :  { %v1032_v44 = vpop.permute.xlu1 %1031 }
0x181f   :  { %v1034_v45 = vadd.f32 %v1032_v44, %v1024_v43 }
0x1821   :  { %1455 = vtanh.f32 %v1034_v45 }
0x182b   :  { %v1456_v52 = vpop.eup %1455 }
0x182c   :  { %1037 = vrot.lane.b32.xlu0 %v1456_v52, %s1457_s1 }
0x189e   :  { %v1038_v55 = vpop.permute.xlu0 %1037 }
0x189f   :  { %v1040_v56 = vmul.f32 %v1454_v5, %v1038_v55 }
0x18a1   :  { %1042 = vrot.lane.b32.xlu0 %v1040_v56, %s1461_s19  ;;  %1050 = vrot.lane.b32.xlu1 %v1040_v56, %s1460_s2 }
0x1913   :  { %v1043_v21 = vpop.permute.xlu0 %1042  ;;  %v1051_v57 = vpop.permute.xlu1 %1050 }
0x1914   :  { %1045 = vst.msk [vmem:[#allocation2] sm:$0xff] %vm303_vm4, %v1043_v21  ;;  %1287 = vmatmul.mubr.msk.f32.vlgmr.msra.gmra.mrb[16].mxu1 %vm186_vm3, %v1051_v57 }
0x19e7   :  { %v1120_v59 = vpop.f32.mrb[16].mxu1 }
0x19e8   :  { %v1121_v60 = vadd.f32 %v1251_v58, %v1120_v59  ;;  %v1288_v62 = vpop.f32.mrb[17].mxu1 }
0x19ea   :  { %v1124_v61 = vmax.f32 %v1121_v60, 0.0 }
0x19ec   :  { %1294 = vmatmul.mubr.msk.f32.vlgmr.msra.gmra.mrb[24].mxu0 %vm1129_vm6, %v1124_v61 }
0x1abf   :  { %v1199_v0 = vpop.f32.mrb[24].mxu0 }
0x1ac0   :  { %v1200_v20 = vadd.f32 %v1253_v63, %v1199_v0  ;;  %v1295_v4 = vpop.f32.mrb[25].mxu0 }
0x1ac2   :  { %1204 = vst.msk [vmem:[%s1804_s4] sm:$0xff] %vm1203_vm7, %v1200_v20 }

</bundles_post_ra>
